<compile_context>
chip_gen: v7x
topology: tpu7x:2x2x1
jax: 0.10.0
libtpu: 0.0.40
codegen_flags: <defaults>
</compile_context>

<pallas_src>
import functools

import jax
import jax.numpy as jnp
from jax import lax
from jax.experimental import pallas as pl
from jax.experimental.pallas import tpu as pltpu


# ----------------------------------------------------------------------------
# Packed-weight-slab layout (all row offsets 8-aligned, width = 3*128 lanes).
# ----------------------------------------------------------------------------
def _slab_layout(input_size, embed_size, hidden_size, output_size, gate_stride=128):
    def rup8(n):
        return -(-n // 8) * 8

    width = 3 * gate_stride
    assert embed_size <= width and hidden_size <= width and output_size <= width
    assert hidden_size <= gate_stride

    off, rows = {}, 0
    for name, nrows in (
        ("we", input_size),    # (I, E)  embedding weight
        ("be", 1),             # (1, E)  embedding bias
        ("wih", embed_size),   # (E, 3G) fused, lane-aligned input-side gates
        ("whh", hidden_size),  # (H, 3G) fused, lane-aligned hidden-side gates
        ("bi", 1),             # (1, 3G) folded gate bias
        ("bhn", 1),            # (1, H)  hidden-side "new" gate bias (r-gated)
        ("wo", hidden_size),   # (H, O)  h2o weight with gamma folded in
        ("bo", 1),             # (1, O)  h2o bias with beta@wo folded in
    ):
        off[name] = rows
        rows += rup8(nrows)
    return off, rows, width


# ----------------------------------------------------------------------------
# One-time parameter packing (do NOT call per forward pass).
# ----------------------------------------------------------------------------
def prepare_params(p, gate_stride=128):
    I, E = p["we"].shape
    H = p["whr"].shape[0]
    O = p["wo"].shape[1]
    G = gate_stride
    off, R, W = _slab_layout(I, E, H, O, G)

    def lane_align_gates(mats):
        # [r | z | n], each gate at lane offset k*G.
        out = jnp.zeros((mats[0].shape[0], 3 * G), jnp.float32)
        for k, m in enumerate(mats):
            out = out.at[:, k * G:k * G + H].set(m)
        return out

    wih = lane_align_gates([p["wir"], p["wiz"], p["win"]])
    whh = lane_align_gates([p["whr"], p["whz"], p["whn"]])
    bi = lane_align_gates(
        [p["bir"] + p["bhr"], p["biz"] + p["bhz"], p["bin"]])

    # Fold LayerNorm affine into the h2o projection.
    wo = p["wo"] * p["gamma"].reshape(-1, 1)          # (H, O)
    bo = p["beta"] @ p["wo"] + p["bo"]                # (1, O)

    slab = jnp.zeros((R, W), jnp.float32)
    slab = slab.at[off["we"]:off["we"] + I, :E].set(p["we"])
    slab = slab.at[off["be"]:off["be"] + 1, :E].set(p["be"])
    slab = slab.at[off["wih"]:off["wih"] + E, :].set(wih)
    slab = slab.at[off["whh"]:off["whh"] + H, :].set(whh)
    slab = slab.at[off["bi"]:off["bi"] + 1, :].set(bi)
    slab = slab.at[off["bhn"]:off["bhn"] + 1, :H].set(p["bhn"])
    slab = slab.at[off["wo"]:off["wo"] + H, :O].set(wo)
    slab = slab.at[off["bo"]:off["bo"] + 1, :O].set(bo)

    cfg = dict(I=I, E=E, H=H, O=O, G=G, off=off, R=R, W=W)
    return slab, cfg


# ----------------------------------------------------------------------------
# Pallas kernel (factory closes over static sizes / slab offsets).
# ----------------------------------------------------------------------------
def _make_kernel(S, B, cfg):
    I, E, H, O, G = cfg["I"], cfg["E"], cfg["H"], cfg["O"], cfg["G"]
    off = cfg["off"]
    eps = 1e-5

    def kernel(x_ref, w_ref, out_ref, hbuf):
        # x_ref : (S*B, I)  time-major rows (step t -> rows [t*B, (t+1)*B))
        # w_ref : (R, 3G)   packed weight slab (one DMA)
        # out_ref: (B, O)
        # hbuf  : (S*B, H)  VMEM scratch for per-step hidden states
        we = w_ref[off["we"]:off["we"] + I, :E]
        be = w_ref[off["be"]:off["be"] + 1, :E]
        wih = w_ref[off["wih"]:off["wih"] + E, :]
        whh = w_ref[off["whh"]:off["whh"] + H, :]
        bi = w_ref[off["bi"]:off["bi"] + 1, :]
        bhn = w_ref[off["bhn"]:off["bhn"] + 1, :H]
        wo = w_ref[off["wo"]:off["wo"] + H, :O]
        bo = w_ref[off["bo"]:off["bo"] + 1, :O]

        # ---- hoisted, batched input-side work (all S*B rows at once) --------
        emb = jnp.dot(x_ref[...], we, preferred_element_type=jnp.float32) + be
        gates_x = jnp.dot(emb, wih, preferred_element_type=jnp.float32) + bi

        def sigmoid(v):
            # exact: single EUP tanh instead of exp + reciprocal
            return 0.5 * (jnp.tanh(0.5 * v) + 1.0)

        # ---- serial recurrence: one fused (B,H)@(H,3G) matmul per step ------
        # TODO(synk): if the bundle dump shows Mosaic re-pushing `whh` to the
        # MXU every step, drive it explicitly with matmul_push_rhs/acc_lhs/pop.
        h = jnp.zeros((B, H), jnp.float32)
        for t in range(S):                                  # static unroll
            gx = gates_x[t * B:(t + 1) * B, :]              # (B, 3G)
            gh = jnp.dot(h, whh, preferred_element_type=jnp.float32)
            r = sigmoid(gx[:, 0:H] + gh[:, 0:H])
            z = sigmoid(gx[:, G:G + H] + gh[:, G:G + H])
            n = jnp.tanh(gx[:, 2 * G:2 * G + H] + r * (gh[:, 2 * G:2 * G + H] + bhn))
            h = (1.0 - z) * n + z * h
            hbuf[t * B:(t + 1) * B, :] = h

        h_all = hbuf[...]                                   # (S*B, H)

        # ---- hoisted LayerNorm (affine folded) + h2o + ReLU -----------------
        mu = jnp.mean(h_all, axis=-1, keepdims=True)
        var = jnp.mean((h_all - mu) ** 2, axis=-1, keepdims=True)
        normed = (h_all - mu) * lax.rsqrt(var + eps)
        o = jnp.dot(normed, wo, preferred_element_type=jnp.float32) + bo
        o = jnp.maximum(o, 0.0)                             # (S*B, O)

        # ---- global_mean_pool over the seq axis (per sequence) --------------
        acc = o[0:B, :]
        for t in range(1, S):
            acc = acc + o[t * B:(t + 1) * B, :]
        out_ref[...] = acc * (1.0 / S)

    return kernel


# ----------------------------------------------------------------------------
# Wrapper: one pallas_call; grid = batch tiles (marked "parallel" for v7x).
# ----------------------------------------------------------------------------
@functools.partial(jax.jit, static_argnames=("S", "B", "BT", "cfg_key"))
def _forward_jit(x_tm, slab, *, S, B, BT, cfg_key):
    cfg = dict(cfg_key[0])
    cfg["off"] = dict(cfg_key[1])
    n_tiles = B // BT
    H, O, R, W = cfg["H"], cfg["O"], cfg["R"], cfg["W"]
    kernel = _make_kernel(S, BT, cfg)
    out = pl.pallas_call(
        kernel,
        out_shape=jax.ShapeDtypeStruct((n_tiles, BT, O), jnp.float32),
        grid=(n_tiles,),
        in_specs=[
            pl.BlockSpec((None, S * BT, cfg["I"]), lambda g: (g, 0, 0)),
            pl.BlockSpec((R, W), lambda g: (0, 0)),   # resident across grid
        ],
        out_specs=pl.BlockSpec((None, BT, O), lambda g: (g, 0, 0)),
        scratch_shapes=[pltpu.VMEM((S * BT, H), jnp.float32)],
        compiler_params=pltpu.CompilerParams(
            dimension_semantics=("parallel",)),
    )(x_tm, slab)
    return out.reshape(B, O)


def simple_lstm_forward(x, slab, cfg, batch_tile=None):
    """x: (B, S, I) batch of sequences, or a single (S, I) sequence."""
    if x.ndim == 2:
        x = x[None]
    B, S, I = x.shape
    BT = B if batch_tile is None else batch_tile
    assert B % BT == 0, "batch must be divisible by batch_tile"
    n_tiles = B // BT
    # Per-tile time-major layout: within a tile, step t's rows are contiguous.
    x_tm = (x.reshape(n_tiles, BT, S, I)
             .transpose(0, 2, 1, 3)
             .reshape(n_tiles, S * BT, I))
    cfg_key = (
        tuple((k, v) for k, v in cfg.items() if k != "off"),
        tuple(sorted(cfg["off"].items())),
    )
    return _forward_jit(x_tm, slab, S=S, B=B, BT=BT, cfg_key=cfg_key)


# ----------------------------------------------------------------------------
# Pure-JAX reference (same math as the PyTorch module) for correctness check.
# ----------------------------------------------------------------------------
def simple_lstm_reference(x, p):
    emb = x @ p["we"] + p["be"]
    seq = x.shape[0]
    hidden = p["whr"].shape[0]
    h = jnp.zeros((1, hidden), jnp.float32)
    outs = []
    for t in range(seq):
        x_t = emb[t:t + 1]
        r = jax.nn.sigmoid(x_t @ p["wir"] + p["bir"] + h @ p["whr"] + p["bhr"])
        z = jax.nn.sigmoid(x_t @ p["wiz"] + p["biz"] + h @ p["whz"] + p["bhz"])
        n = jnp.tanh(x_t @ p["win"] + p["bin"] + r * (h @ p["whn"] + p["bhn"]))
        h = (1.0 - z) * n + z * h
        mu = jnp.mean(h, axis=-1, keepdims=True)
        var = jnp.mean((h - mu) ** 2, axis=-1, keepdims=True)
        normed = (h - mu) * lax.rsqrt(var + 1e-5) * p["gamma"] + p["beta"]
        o = jnp.maximum(normed @ p["wo"] + p["bo"], 0.0)
        outs.append(o)
    return jnp.mean(jnp.concatenate(outs, axis=0), axis=0, keepdims=True)


# ----------------------------------------------------------------------------
# Deterministic parameter init (shapes follow the PyTorch module's __init__).
# ----------------------------------------------------------------------------
def init_params(key, input_size, embed_size, hidden_size, output_size):
    ks = jax.random.split(key, 16)
    s = 0.1

    def rnd(k, shape):
        return jax.random.normal(k, shape, dtype=jnp.float32) * s

    return {
        "we": rnd(ks[0], (input_size, embed_size)),
        "be": rnd(ks[1], (1, embed_size)),
        "wir": rnd(ks[2], (embed_size, hidden_size)),
        "wiz": rnd(ks[3], (embed_size, hidden_size)),
        "win": rnd(ks[4], (embed_size, hidden_size)),
        "whr": rnd(ks[5], (hidden_size, hidden_size)),
        "whz": rnd(ks[6], (hidden_size, hidden_size)),
        "whn": rnd(ks[7], (hidden_size, hidden_size)),
        "bir": rnd(ks[8], (1, hidden_size)),
        "biz": rnd(ks[9], (1, hidden_size)),
        "bin": rnd(ks[10], (1, hidden_size)),
        "bhr": rnd(ks[11], (1, hidden_size)),
        "bhz": rnd(ks[12], (1, hidden_size)),
        "bhn": rnd(ks[13], (1, hidden_size)),
        "gamma": jnp.ones((1, hidden_size), jnp.float32),
        "beta": jnp.zeros((1, hidden_size), jnp.float32),
        "wo": rnd(ks[14], (hidden_size, output_size)),
        "bo": rnd(ks[15], (1, output_size)),
    }


if __name__ == "__main__":
    SEQ = 8
    INPUT_SIZE = 16
    EMBED_SIZE = 64
    HIDDEN_SIZE = 32
    OUTPUT_SIZE = 8
    BATCH = 2

    key = jax.random.PRNGKey(0)
    kx, kp = jax.random.split(key)
    x = jax.random.normal(kx, (BATCH, SEQ, INPUT_SIZE), dtype=jnp.float32)
    params = init_params(kp, INPUT_SIZE, EMBED_SIZE, HIDDEN_SIZE, OUTPUT_SIZE)

    slab, cfg = prepare_params(params)          # built ONCE, reused every call

    out = simple_lstm_forward(x, slab, cfg)
    out = jax.block_until_ready(out)

    ref = jnp.concatenate(
        [simple_lstm_reference(x[b], params) for b in range(BATCH)], axis=0)
    assert out.shape == (BATCH, OUTPUT_SIZE)
    assert jnp.allclose(out, ref, atol=1e-4, rtol=1e-4), (out, ref)

    print("KERNEL_OK")
</pallas_src>

<mosaic_0001>
module attributes {stable_mosaic.version = 11 : i64} {
  func.func @kernel(%arg0: i32, %arg1: memref<1x16x16xf32, #tpu.memory_space<vmem>>, %arg2: memref<176x384xf32, #tpu.memory_space<vmem>>, %arg3: memref<1x2x8xf32, #tpu.memory_space<vmem>>, %arg4: memref<16x32xf32, #tpu.memory_space<vmem>>) attributes {dimension_semantics = [#tpu.dimension_semantics<parallel>], iteration_bounds = array<i64: 1>, scalar_prefetch = 0 : i64, scratch_operands = 1 : i64, tpu.core_type = #tpu.core_type<tc>, window_params = [{transform_indices = @transform_0, window_bounds = array<i64: 1, 16, 16>}, {pipeline_mode = #tpu.pipeline_mode<synchronous>, transform_indices = @transform_1, window_bounds = array<i64: 176, 384>}, {transform_indices = @transform_2, window_bounds = array<i64: 1, 2, 8>}]} {
    %c0 = arith.constant 0 : index
    %c0_0 = arith.constant 0 : index
    %0 = vector.load %arg2[%c0, %c0_0] : memref<176x384xf32, #tpu.memory_space<vmem>>, vector<16x64xf32>
    %c16 = arith.constant 16 : index
    %c0_1 = arith.constant 0 : index
    %1 = vector.load %arg2[%c16, %c0_1] : memref<176x384xf32, #tpu.memory_space<vmem>>, vector<1x64xf32>
    %c24 = arith.constant 24 : index
    %c0_2 = arith.constant 0 : index
    %2 = vector.load %arg2[%c24, %c0_2] : memref<176x384xf32, #tpu.memory_space<vmem>>, vector<64x384xf32>
    %c88 = arith.constant 88 : index
    %c0_3 = arith.constant 0 : index
    %3 = vector.load %arg2[%c88, %c0_3] : memref<176x384xf32, #tpu.memory_space<vmem>>, vector<32x384xf32>
    %c120 = arith.constant 120 : index
    %c0_4 = arith.constant 0 : index
    %4 = vector.load %arg2[%c120, %c0_4] : memref<176x384xf32, #tpu.memory_space<vmem>>, vector<1x384xf32>
    %c128 = arith.constant 128 : index
    %c0_5 = arith.constant 0 : index
    %5 = vector.load %arg2[%c128, %c0_5] : memref<176x384xf32, #tpu.memory_space<vmem>>, vector<1x32xf32>
    %c136 = arith.constant 136 : index
    %c0_6 = arith.constant 0 : index
    %6 = vector.load %arg2[%c136, %c0_6] : memref<176x384xf32, #tpu.memory_space<vmem>>, vector<32x8xf32>
    %c168 = arith.constant 168 : index
    %c0_7 = arith.constant 0 : index
    %7 = vector.load %arg2[%c168, %c0_7] : memref<176x384xf32, #tpu.memory_space<vmem>>, vector<1x8xf32>
    %c0_8 = arith.constant 0 : index
    %c0_9 = arith.constant 0 : index
    %c0_10 = arith.constant 0 : index
    %8 = vector.load %arg1[%c0_8, %c0_9, %c0_10] : memref<1x16x16xf32, #tpu.memory_space<vmem>>, vector<1x16x16xf32>
    %9 = vector.shape_cast %8 : vector<1x16x16xf32> to vector<16x16xf32>
    %cst = arith.constant dense<0.000000e+00> : vector<16x64xf32>
    %10 = tpu.matmul %9, %0, %cst {dimension_numbers = #tpu.dot_dimension_numbers<[1], [0], [0], [1], [0, 0, 1, 1], [], []>} : vector<16x16xf32>, vector<16x64xf32>, vector<16x64xf32> -> vector<16x64xf32>
    %11 = vector.broadcast %1 : vector<1x64xf32> to vector<16x64xf32>
    %12 = arith.addf %10, %11 : vector<16x64xf32>
    %cst_11 = arith.constant dense<0.000000e+00> : vector<16x384xf32>
    %13 = tpu.matmul %12, %2, %cst_11 {dimension_numbers = #tpu.dot_dimension_numbers<[1], [0], [0], [1], [0, 0, 1, 1], [], []>} : vector<16x64xf32>, vector<64x384xf32>, vector<16x384xf32> -> vector<16x384xf32>
    %14 = vector.broadcast %4 : vector<1x384xf32> to vector<16x384xf32>
    %15 = arith.addf %13, %14 : vector<16x384xf32>
    %cst_12 = arith.constant 0.000000e+00 : f32
    %16 = vector.broadcast %cst_12 : f32 to vector<2x32xf32>
    %17 = vector.extract_strided_slice %15 {offsets = [0, 0], sizes = [2, 384], strides = [1, 1]} : vector<16x384xf32> to vector<2x384xf32>
    %cst_13 = arith.constant dense<0.000000e+00> : vector<2x384xf32>
    %18 = tpu.matmul %16, %3, %cst_13 {dimension_numbers = #tpu.dot_dimension_numbers<[1], [0], [0], [1], [0, 0, 1, 1], [], []>} : vector<2x32xf32>, vector<32x384xf32>, vector<2x384xf32> -> vector<2x384xf32>
    %19 = vector.extract_strided_slice %17 {offsets = [0, 0], sizes = [2, 32], strides = [1, 1]} : vector<2x384xf32> to vector<2x32xf32>
    %20 = vector.extract_strided_slice %18 {offsets = [0, 0], sizes = [2, 32], strides = [1, 1]} : vector<2x384xf32> to vector<2x32xf32>
    %21 = arith.addf %19, %20 : vector<2x32xf32>
    %cst_14 = arith.constant 5.000000e-01 : f32
    %22 = vector.broadcast %cst_14 : f32 to vector<2x32xf32>
    %23 = arith.mulf %22, %21 : vector<2x32xf32>
    %24 = math.tanh %23 : vector<2x32xf32>
    %cst_15 = arith.constant 1.000000e+00 : f32
    %25 = vector.broadcast %cst_15 : f32 to vector<2x32xf32>
    %26 = arith.addf %24, %25 : vector<2x32xf32>
    %cst_16 = arith.constant 5.000000e-01 : f32
    %27 = vector.broadcast %cst_16 : f32 to vector<2x32xf32>
    %28 = arith.mulf %27, %26 : vector<2x32xf32>
    %29 = vector.extract_strided_slice %17 {offsets = [0, 128], sizes = [2, 32], strides = [1, 1]} : vector<2x384xf32> to vector<2x32xf32>
    %30 = vector.extract_strided_slice %18 {offsets = [0, 128], sizes = [2, 32], strides = [1, 1]} : vector<2x384xf32> to vector<2x32xf32>
    %31 = arith.addf %29, %30 : vector<2x32xf32>
    %cst_17 = arith.constant 5.000000e-01 : f32
    %32 = vector.broadcast %cst_17 : f32 to vector<2x32xf32>
    %33 = arith.mulf %32, %31 : vector<2x32xf32>
    %34 = math.tanh %33 : vector<2x32xf32>
    %cst_18 = arith.constant 1.000000e+00 : f32
    %35 = vector.broadcast %cst_18 : f32 to vector<2x32xf32>
    %36 = arith.addf %34, %35 : vector<2x32xf32>
    %cst_19 = arith.constant 5.000000e-01 : f32
    %37 = vector.broadcast %cst_19 : f32 to vector<2x32xf32>
    %38 = arith.mulf %37, %36 : vector<2x32xf32>
    %39 = vector.extract_strided_slice %17 {offsets = [0, 256], sizes = [2, 32], strides = [1, 1]} : vector<2x384xf32> to vector<2x32xf32>
    %40 = vector.extract_strided_slice %18 {offsets = [0, 256], sizes = [2, 32], strides = [1, 1]} : vector<2x384xf32> to vector<2x32xf32>
    %41 = vector.broadcast %5 : vector<1x32xf32> to vector<2x32xf32>
    %42 = arith.addf %40, %41 : vector<2x32xf32>
    %43 = arith.mulf %28, %42 : vector<2x32xf32>
    %44 = arith.addf %39, %43 : vector<2x32xf32>
    %45 = math.tanh %44 : vector<2x32xf32>
    %cst_20 = arith.constant 1.000000e+00 : f32
    %46 = vector.broadcast %cst_20 : f32 to vector<2x32xf32>
    %47 = arith.subf %46, %38 : vector<2x32xf32>
    %48 = arith.mulf %47, %45 : vector<2x32xf32>
    %49 = arith.mulf %38, %16 : vector<2x32xf32>
    %50 = arith.addf %48, %49 : vector<2x32xf32>
    %c0_21 = arith.constant 0 : index
    %c0_22 = arith.constant 0 : index
    %51 = vector.load %arg4[%c0_21, %c0_22] : memref<16x32xf32, #tpu.memory_space<vmem>>, vector<2x32xf32>
    tpu.vector_store %arg4[%c0_21, %c0_22], %50 {strides = array<i32>} : memref<16x32xf32, #tpu.memory_space<vmem>>, vector<2x32xf32>,
    %52 = vector.extract_strided_slice %15 {offsets = [2, 0], sizes = [2, 384], strides = [1, 1]} : vector<16x384xf32> to vector<2x384xf32>
    %cst_23 = arith.constant dense<0.000000e+00> : vector<2x384xf32>
    %53 = tpu.matmul %50, %3, %cst_23 {dimension_numbers = #tpu.dot_dimension_numbers<[1], [0], [0], [1], [0, 0, 1, 1], [], []>} : vector<2x32xf32>, vector<32x384xf32>, vector<2x384xf32> -> vector<2x384xf32>
    %54 = vector.extract_strided_slice %52 {offsets = [0, 0], sizes = [2, 32], strides = [1, 1]} : vector<2x384xf32> to vector<2x32xf32>
    %55 = vector.extract_strided_slice %53 {offsets = [0, 0], sizes = [2, 32], strides = [1, 1]} : vector<2x384xf32> to vector<2x32xf32>
    %56 = arith.addf %54, %55 : vector<2x32xf32>
    %cst_24 = arith.constant 5.000000e-01 : f32
    %57 = vector.broadcast %cst_24 : f32 to vector<2x32xf32>
    %58 = arith.mulf %57, %56 : vector<2x32xf32>
    %59 = math.tanh %58 : vector<2x32xf32>
    %cst_25 = arith.constant 1.000000e+00 : f32
    %60 = vector.broadcast %cst_25 : f32 to vector<2x32xf32>
    %61 = arith.addf %59, %60 : vector<2x32xf32>
    %cst_26 = arith.constant 5.000000e-01 : f32
    %62 = vector.broadcast %cst_26 : f32 to vector<2x32xf32>
    %63 = arith.mulf %62, %61 : vector<2x32xf32>
    %64 = vector.extract_strided_slice %52 {offsets = [0, 128], sizes = [2, 32], strides = [1, 1]} : vector<2x384xf32> to vector<2x32xf32>
    %65 = vector.extract_strided_slice %53 {offsets = [0, 128], sizes = [2, 32], strides = [1, 1]} : vector<2x384xf32> to vector<2x32xf32>
    %66 = arith.addf %64, %65 : vector<2x32xf32>
    %cst_27 = arith.constant 5.000000e-01 : f32
    %67 = vector.broadcast %cst_27 : f32 to vector<2x32xf32>
    %68 = arith.mulf %67, %66 : vector<2x32xf32>
    %69 = math.tanh %68 : vector<2x32xf32>
    %cst_28 = arith.constant 1.000000e+00 : f32
    %70 = vector.broadcast %cst_28 : f32 to vector<2x32xf32>
    %71 = arith.addf %69, %70 : vector<2x32xf32>
    %cst_29 = arith.constant 5.000000e-01 : f32
    %72 = vector.broadcast %cst_29 : f32 to vector<2x32xf32>
    %73 = arith.mulf %72, %71 : vector<2x32xf32>
    %74 = vector.extract_strided_slice %52 {offsets = [0, 256], sizes = [2, 32], strides = [1, 1]} : vector<2x384xf32> to vector<2x32xf32>
    %75 = vector.extract_strided_slice %53 {offsets = [0, 256], sizes = [2, 32], strides = [1, 1]} : vector<2x384xf32> to vector<2x32xf32>
    %76 = vector.broadcast %5 : vector<1x32xf32> to vector<2x32xf32>
    %77 = arith.addf %75, %76 : vector<2x32xf32>
    %78 = arith.mulf %63, %77 : vector<2x32xf32>
    %79 = arith.addf %74, %78 : vector<2x32xf32>
    %80 = math.tanh %79 : vector<2x32xf32>
    %cst_30 = arith.constant 1.000000e+00 : f32
    %81 = vector.broadcast %cst_30 : f32 to vector<2x32xf32>
    %82 = arith.subf %81, %73 : vector<2x32xf32>
    %83 = arith.mulf %82, %80 : vector<2x32xf32>
    %84 = arith.mulf %73, %50 : vector<2x32xf32>
    %85 = arith.addf %83, %84 : vector<2x32xf32>
    %c2 = arith.constant 2 : index
    %c0_31 = arith.constant 0 : index
    %86 = vector.load %arg4[%c2, %c0_31] : memref<16x32xf32, #tpu.memory_space<vmem>>, vector<2x32xf32>
    tpu.vector_store %arg4[%c2, %c0_31], %85 {strides = array<i32>} : memref<16x32xf32, #tpu.memory_space<vmem>>, vector<2x32xf32>,
    %87 = vector.extract_strided_slice %15 {offsets = [4, 0], sizes = [2, 384], strides = [1, 1]} : vector<16x384xf32> to vector<2x384xf32>
    %cst_32 = arith.constant dense<0.000000e+00> : vector<2x384xf32>
    %88 = tpu.matmul %85, %3, %cst_32 {dimension_numbers = #tpu.dot_dimension_numbers<[1], [0], [0], [1], [0, 0, 1, 1], [], []>} : vector<2x32xf32>, vector<32x384xf32>, vector<2x384xf32> -> vector<2x384xf32>
    %89 = vector.extract_strided_slice %87 {offsets = [0, 0], sizes = [2, 32], strides = [1, 1]} : vector<2x384xf32> to vector<2x32xf32>
    %90 = vector.extract_strided_slice %88 {offsets = [0, 0], sizes = [2, 32], strides = [1, 1]} : vector<2x384xf32> to vector<2x32xf32>
    %91 = arith.addf %89, %90 : vector<2x32xf32>
    %cst_33 = arith.constant 5.000000e-01 : f32
    %92 = vector.broadcast %cst_33 : f32 to vector<2x32xf32>
    %93 = arith.mulf %92, %91 : vector<2x32xf32>
    %94 = math.tanh %93 : vector<2x32xf32>
    %cst_34 = arith.constant 1.000000e+00 : f32
    %95 = vector.broadcast %cst_34 : f32 to vector<2x32xf32>
    %96 = arith.addf %94, %95 : vector<2x32xf32>
    %cst_35 = arith.constant 5.000000e-01 : f32
    %97 = vector.broadcast %cst_35 : f32 to vector<2x32xf32>
    %98 = arith.mulf %97, %96 : vector<2x32xf32>
    %99 = vector.extract_strided_slice %87 {offsets = [0, 128], sizes = [2, 32], strides = [1, 1]} : vector<2x384xf32> to vector<2x32xf32>
    %100 = vector.extract_strided_slice %88 {offsets = [0, 128], sizes = [2, 32], strides = [1, 1]} : vector<2x384xf32> to vector<2x32xf32>
    %101 = arith.addf %99, %100 : vector<2x32xf32>
    %cst_36 = arith.constant 5.000000e-01 : f32
    %102 = vector.broadcast %cst_36 : f32 to vector<2x32xf32>
    %103 = arith.mulf %102, %101 : vector<2x32xf32>
    %104 = math.tanh %103 : vector<2x32xf32>
    %cst_37 = arith.constant 1.000000e+00 : f32
    %105 = vector.broadcast %cst_37 : f32 to vector<2x32xf32>
    %106 = arith.addf %104, %105 : vector<2x32xf32>
    %cst_38 = arith.constant 5.000000e-01 : f32
    %107 = vector.broadcast %cst_38 : f32 to vector<2x32xf32>
    %108 = arith.mulf %107, %106 : vector<2x32xf32>
    %109 = vector.extract_strided_slice %87 {offsets = [0, 256], sizes = [2, 32], strides = [1, 1]} : vector<2x384xf32> to vector<2x32xf32>
    %110 = vector.extract_strided_slice %88 {offsets = [0, 256], sizes = [2, 32], strides = [1, 1]} : vector<2x384xf32> to vector<2x32xf32>
    %111 = vector.broadcast %5 : vector<1x32xf32> to vector<2x32xf32>
    %112 = arith.addf %110, %111 : vector<2x32xf32>
    %113 = arith.mulf %98, %112 : vector<2x32xf32>
    %114 = arith.addf %109, %113 : vector<2x32xf32>
    %115 = math.tanh %114 : vector<2x32xf32>
    %cst_39 = arith.constant 1.000000e+00 : f32
    %116 = vector.broadcast %cst_39 : f32 to vector<2x32xf32>
    %117 = arith.subf %116, %108 : vector<2x32xf32>
    %118 = arith.mulf %117, %115 : vector<2x32xf32>
    %119 = arith.mulf %108, %85 : vector<2x32xf32>
    %120 = arith.addf %118, %119 : vector<2x32xf32>
    %c4 = arith.constant 4 : index
    %c0_40 = arith.constant 0 : index
    %121 = vector.load %arg4[%c4, %c0_40] : memref<16x32xf32, #tpu.memory_space<vmem>>, vector<2x32xf32>
    tpu.vector_store %arg4[%c4, %c0_40], %120 {strides = array<i32>} : memref<16x32xf32, #tpu.memory_space<vmem>>, vector<2x32xf32>,
    %122 = vector.extract_strided_slice %15 {offsets = [6, 0], sizes = [2, 384], strides = [1, 1]} : vector<16x384xf32> to vector<2x384xf32>
    %cst_41 = arith.constant dense<0.000000e+00> : vector<2x384xf32>
    %123 = tpu.matmul %120, %3, %cst_41 {dimension_numbers = #tpu.dot_dimension_numbers<[1], [0], [0], [1], [0, 0, 1, 1], [], []>} : vector<2x32xf32>, vector<32x384xf32>, vector<2x384xf32> -> vector<2x384xf32>
    %124 = vector.extract_strided_slice %122 {offsets = [0, 0], sizes = [2, 32], strides = [1, 1]} : vector<2x384xf32> to vector<2x32xf32>
    %125 = vector.extract_strided_slice %123 {offsets = [0, 0], sizes = [2, 32], strides = [1, 1]} : vector<2x384xf32> to vector<2x32xf32>
    %126 = arith.addf %124, %125 : vector<2x32xf32>
    %cst_42 = arith.constant 5.000000e-01 : f32
    %127 = vector.broadcast %cst_42 : f32 to vector<2x32xf32>
    %128 = arith.mulf %127, %126 : vector<2x32xf32>
    %129 = math.tanh %128 : vector<2x32xf32>
    %cst_43 = arith.constant 1.000000e+00 : f32
    %130 = vector.broadcast %cst_43 : f32 to vector<2x32xf32>
    %131 = arith.addf %129, %130 : vector<2x32xf32>
    %cst_44 = arith.constant 5.000000e-01 : f32
    %132 = vector.broadcast %cst_44 : f32 to vector<2x32xf32>
    %133 = arith.mulf %132, %131 : vector<2x32xf32>
    %134 = vector.extract_strided_slice %122 {offsets = [0, 128], sizes = [2, 32], strides = [1, 1]} : vector<2x384xf32> to vector<2x32xf32>
    %135 = vector.extract_strided_slice %123 {offsets = [0, 128], sizes = [2, 32], strides = [1, 1]} : vector<2x384xf32> to vector<2x32xf32>
    %136 = arith.addf %134, %135 : vector<2x32xf32>
    %cst_45 = arith.constant 5.000000e-01 : f32
    %137 = vector.broadcast %cst_45 : f32 to vector<2x32xf32>
    %138 = arith.mulf %137, %136 : vector<2x32xf32>
    %139 = math.tanh %138 : vector<2x32xf32>
    %cst_46 = arith.constant 1.000000e+00 : f32
    %140 = vector.broadcast %cst_46 : f32 to vector<2x32xf32>
    %141 = arith.addf %139, %140 : vector<2x32xf32>
    %cst_47 = arith.constant 5.000000e-01 : f32
    %142 = vector.broadcast %cst_47 : f32 to vector<2x32xf32>
    %143 = arith.mulf %142, %141 : vector<2x32xf32>
    %144 = vector.extract_strided_slice %122 {offsets = [0, 256], sizes = [2, 32], strides = [1, 1]} : vector<2x384xf32> to vector<2x32xf32>
    %145 = vector.extract_strided_slice %123 {offsets = [0, 256], sizes = [2, 32], strides = [1, 1]} : vector<2x384xf32> to vector<2x32xf32>
    %146 = vector.broadcast %5 : vector<1x32xf32> to vector<2x32xf32>
    %147 = arith.addf %145, %146 : vector<2x32xf32>
    %148 = arith.mulf %133, %147 : vector<2x32xf32>
    %149 = arith.addf %144, %148 : vector<2x32xf32>
    %150 = math.tanh %149 : vector<2x32xf32>
    %cst_48 = arith.constant 1.000000e+00 : f32
    %151 = vector.broadcast %cst_48 : f32 to vector<2x32xf32>
    %152 = arith.subf %151, %143 : vector<2x32xf32>
    %153 = arith.mulf %152, %150 : vector<2x32xf32>
    %154 = arith.mulf %143, %120 : vector<2x32xf32>
    %155 = arith.addf %153, %154 : vector<2x32xf32>
    %c6 = arith.constant 6 : index
    %c0_49 = arith.constant 0 : index
    %156 = vector.load %arg4[%c6, %c0_49] : memref<16x32xf32, #tpu.memory_space<vmem>>, vector<2x32xf32>
    tpu.vector_store %arg4[%c6, %c0_49], %155 {strides = array<i32>} : memref<16x32xf32, #tpu.memory_space<vmem>>, vector<2x32xf32>,
    %157 = vector.extract_strided_slice %15 {offsets = [8, 0], sizes = [2, 384], strides = [1, 1]} : vector<16x384xf32> to vector<2x384xf32>
    %cst_50 = arith.constant dense<0.000000e+00> : vector<2x384xf32>
    %158 = tpu.matmul %155, %3, %cst_50 {dimension_numbers = #tpu.dot_dimension_numbers<[1], [0], [0], [1], [0, 0, 1, 1], [], []>} : vector<2x32xf32>, vector<32x384xf32>, vector<2x384xf32> -> vector<2x384xf32>
    %159 = vector.extract_strided_slice %157 {offsets = [0, 0], sizes = [2, 32], strides = [1, 1]} : vector<2x384xf32> to vector<2x32xf32>
    %160 = vector.extract_strided_slice %158 {offsets = [0, 0], sizes = [2, 32], strides = [1, 1]} : vector<2x384xf32> to vector<2x32xf32>
    %161 = arith.addf %159, %160 : vector<2x32xf32>
    %cst_51 = arith.constant 5.000000e-01 : f32
    %162 = vector.broadcast %cst_51 : f32 to vector<2x32xf32>
    %163 = arith.mulf %162, %161 : vector<2x32xf32>
    %164 = math.tanh %163 : vector<2x32xf32>
    %cst_52 = arith.constant 1.000000e+00 : f32
    %165 = vector.broadcast %cst_52 : f32 to vector<2x32xf32>
    %166 = arith.addf %164, %165 : vector<2x32xf32>
    %cst_53 = arith.constant 5.000000e-01 : f32
    %167 = vector.broadcast %cst_53 : f32 to vector<2x32xf32>
    %168 = arith.mulf %167, %166 : vector<2x32xf32>
    %169 = vector.extract_strided_slice %157 {offsets = [0, 128], sizes = [2, 32], strides = [1, 1]} : vector<2x384xf32> to vector<2x32xf32>
    %170 = vector.extract_strided_slice %158 {offsets = [0, 128], sizes = [2, 32], strides = [1, 1]} : vector<2x384xf32> to vector<2x32xf32>
    %171 = arith.addf %169, %170 : vector<2x32xf32>
    %cst_54 = arith.constant 5.000000e-01 : f32
    %172 = vector.broadcast %cst_54 : f32 to vector<2x32xf32>
    %173 = arith.mulf %172, %171 : vector<2x32xf32>
    %174 = math.tanh %173 : vector<2x32xf32>
    %cst_55 = arith.constant 1.000000e+00 : f32
    %175 = vector.broadcast %cst_55 : f32 to vector<2x32xf32>
    %176 = arith.addf %174, %175 : vector<2x32xf32>
    %cst_56 = arith.constant 5.000000e-01 : f32
    %177 = vector.broadcast %cst_56 : f32 to vector<2x32xf32>
    %178 = arith.mulf %177, %176 : vector<2x32xf32>
    %179 = vector.extract_strided_slice %157 {offsets = [0, 256], sizes = [2, 32], strides = [1, 1]} : vector<2x384xf32> to vector<2x32xf32>
    %180 = vector.extract_strided_slice %158 {offsets = [0, 256], sizes = [2, 32], strides = [1, 1]} : vector<2x384xf32> to vector<2x32xf32>
    %181 = vector.broadcast %5 : vector<1x32xf32> to vector<2x32xf32>
    %182 = arith.addf %180, %181 : vector<2x32xf32>
    %183 = arith.mulf %168, %182 : vector<2x32xf32>
    %184 = arith.addf %179, %183 : vector<2x32xf32>
    %185 = math.tanh %184 : vector<2x32xf32>
    %cst_57 = arith.constant 1.000000e+00 : f32
    %186 = vector.broadcast %cst_57 : f32 to vector<2x32xf32>
    %187 = arith.subf %186, %178 : vector<2x32xf32>
    %188 = arith.mulf %187, %185 : vector<2x32xf32>
    %189 = arith.mulf %178, %155 : vector<2x32xf32>
    %190 = arith.addf %188, %189 : vector<2x32xf32>
    %c8 = arith.constant 8 : index
    %c0_58 = arith.constant 0 : index
    %191 = vector.load %arg4[%c8, %c0_58] : memref<16x32xf32, #tpu.memory_space<vmem>>, vector<2x32xf32>
    tpu.vector_store %arg4[%c8, %c0_58], %190 {strides = array<i32>} : memref<16x32xf32, #tpu.memory_space<vmem>>, vector<2x32xf32>,
    %192 = vector.extract_strided_slice %15 {offsets = [10, 0], sizes = [2, 384], strides = [1, 1]} : vector<16x384xf32> to vector<2x384xf32>
    %cst_59 = arith.constant dense<0.000000e+00> : vector<2x384xf32>
    %193 = tpu.matmul %190, %3, %cst_59 {dimension_numbers = #tpu.dot_dimension_numbers<[1], [0], [0], [1], [0, 0, 1, 1], [], []>} : vector<2x32xf32>, vector<32x384xf32>, vector<2x384xf32> -> vector<2x384xf32>
    %194 = vector.extract_strided_slice %192 {offsets = [0, 0], sizes = [2, 32], strides = [1, 1]} : vector<2x384xf32> to vector<2x32xf32>
    %195 = vector.extract_strided_slice %193 {offsets = [0, 0], sizes = [2, 32], strides = [1, 1]} : vector<2x384xf32> to vector<2x32xf32>
    %196 = arith.addf %194, %195 : vector<2x32xf32>
    %cst_60 = arith.constant 5.000000e-01 : f32
    %197 = vector.broadcast %cst_60 : f32 to vector<2x32xf32>
    %198 = arith.mulf %197, %196 : vector<2x32xf32>
    %199 = math.tanh %198 : vector<2x32xf32>
    %cst_61 = arith.constant 1.000000e+00 : f32
    %200 = vector.broadcast %cst_61 : f32 to vector<2x32xf32>
    %201 = arith.addf %199, %200 : vector<2x32xf32>
    %cst_62 = arith.constant 5.000000e-01 : f32
    %202 = vector.broadcast %cst_62 : f32 to vector<2x32xf32>
    %203 = arith.mulf %202, %201 : vector<2x32xf32>
    %204 = vector.extract_strided_slice %192 {offsets = [0, 128], sizes = [2, 32], strides = [1, 1]} : vector<2x384xf32> to vector<2x32xf32>
    %205 = vector.extract_strided_slice %193 {offsets = [0, 128], sizes = [2, 32], strides = [1, 1]} : vector<2x384xf32> to vector<2x32xf32>
    %206 = arith.addf %204, %205 : vector<2x32xf32>
    %cst_63 = arith.constant 5.000000e-01 : f32
    %207 = vector.broadcast %cst_63 : f32 to vector<2x32xf32>
    %208 = arith.mulf %207, %206 : vector<2x32xf32>
    %209 = math.tanh %208 : vector<2x32xf32>
    %cst_64 = arith.constant 1.000000e+00 : f32
    %210 = vector.broadcast %cst_64 : f32 to vector<2x32xf32>
    %211 = arith.addf %209, %210 : vector<2x32xf32>
    %cst_65 = arith.constant 5.000000e-01 : f32
    %212 = vector.broadcast %cst_65 : f32 to vector<2x32xf32>
    %213 = arith.mulf %212, %211 : vector<2x32xf32>
    %214 = vector.extract_strided_slice %192 {offsets = [0, 256], sizes = [2, 32], strides = [1, 1]} : vector<2x384xf32> to vector<2x32xf32>
    %215 = vector.extract_strided_slice %193 {offsets = [0, 256], sizes = [2, 32], strides = [1, 1]} : vector<2x384xf32> to vector<2x32xf32>
    %216 = vector.broadcast %5 : vector<1x32xf32> to vector<2x32xf32>
    %217 = arith.addf %215, %216 : vector<2x32xf32>
    %218 = arith.mulf %203, %217 : vector<2x32xf32>
    %219 = arith.addf %214, %218 : vector<2x32xf32>
    %220 = math.tanh %219 : vector<2x32xf32>
    %cst_66 = arith.constant 1.000000e+00 : f32
    %221 = vector.broadcast %cst_66 : f32 to vector<2x32xf32>
    %222 = arith.subf %221, %213 : vector<2x32xf32>
    %223 = arith.mulf %222, %220 : vector<2x32xf32>
    %224 = arith.mulf %213, %190 : vector<2x32xf32>
    %225 = arith.addf %223, %224 : vector<2x32xf32>
    %c10 = arith.constant 10 : index
    %c0_67 = arith.constant 0 : index
    %226 = vector.load %arg4[%c10, %c0_67] : memref<16x32xf32, #tpu.memory_space<vmem>>, vector<2x32xf32>
    tpu.vector_store %arg4[%c10, %c0_67], %225 {strides = array<i32>} : memref<16x32xf32, #tpu.memory_space<vmem>>, vector<2x32xf32>,
    %227 = vector.extract_strided_slice %15 {offsets = [12, 0], sizes = [2, 384], strides = [1, 1]} : vector<16x384xf32> to vector<2x384xf32>
    %cst_68 = arith.constant dense<0.000000e+00> : vector<2x384xf32>
    %228 = tpu.matmul %225, %3, %cst_68 {dimension_numbers = #tpu.dot_dimension_numbers<[1], [0], [0], [1], [0, 0, 1, 1], [], []>} : vector<2x32xf32>, vector<32x384xf32>, vector<2x384xf32> -> vector<2x384xf32>
    %229 = vector.extract_strided_slice %227 {offsets = [0, 0], sizes = [2, 32], strides = [1, 1]} : vector<2x384xf32> to vector<2x32xf32>
    %230 = vector.extract_strided_slice %228 {offsets = [0, 0], sizes = [2, 32], strides = [1, 1]} : vector<2x384xf32> to vector<2x32xf32>
    %231 = arith.addf %229, %230 : vector<2x32xf32>
    %cst_69 = arith.constant 5.000000e-01 : f32
    %232 = vector.broadcast %cst_69 : f32 to vector<2x32xf32>
    %233 = arith.mulf %232, %231 : vector<2x32xf32>
    %234 = math.tanh %233 : vector<2x32xf32>
    %cst_70 = arith.constant 1.000000e+00 : f32
    %235 = vector.broadcast %cst_70 : f32 to vector<2x32xf32>
    %236 = arith.addf %234, %235 : vector<2x32xf32>
    %cst_71 = arith.constant 5.000000e-01 : f32
    %237 = vector.broadcast %cst_71 : f32 to vector<2x32xf32>
    %238 = arith.mulf %237, %236 : vector<2x32xf32>
    %239 = vector.extract_strided_slice %227 {offsets = [0, 128], sizes = [2, 32], strides = [1, 1]} : vector<2x384xf32> to vector<2x32xf32>
    %240 = vector.extract_strided_slice %228 {offsets = [0, 128], sizes = [2, 32], strides = [1, 1]} : vector<2x384xf32> to vector<2x32xf32>
    %241 = arith.addf %239, %240 : vector<2x32xf32>
    %cst_72 = arith.constant 5.000000e-01 : f32
    %242 = vector.broadcast %cst_72 : f32 to vector<2x32xf32>
    %243 = arith.mulf %242, %241 : vector<2x32xf32>
    %244 = math.tanh %243 : vector<2x32xf32>
    %cst_73 = arith.constant 1.000000e+00 : f32
    %245 = vector.broadcast %cst_73 : f32 to vector<2x32xf32>
    %246 = arith.addf %244, %245 : vector<2x32xf32>
    %cst_74 = arith.constant 5.000000e-01 : f32
    %247 = vector.broadcast %cst_74 : f32 to vector<2x32xf32>
    %248 = arith.mulf %247, %246 : vector<2x32xf32>
    %249 = vector.extract_strided_slice %227 {offsets = [0, 256], sizes = [2, 32], strides = [1, 1]} : vector<2x384xf32> to vector<2x32xf32>
    %250 = vector.extract_strided_slice %228 {offsets = [0, 256], sizes = [2, 32], strides = [1, 1]} : vector<2x384xf32> to vector<2x32xf32>
    %251 = vector.broadcast %5 : vector<1x32xf32> to vector<2x32xf32>
    %252 = arith.addf %250, %251 : vector<2x32xf32>
    %253 = arith.mulf %238, %252 : vector<2x32xf32>
    %254 = arith.addf %249, %253 : vector<2x32xf32>
    %255 = math.tanh %254 : vector<2x32xf32>
    %cst_75 = arith.constant 1.000000e+00 : f32
    %256 = vector.broadcast %cst_75 : f32 to vector<2x32xf32>
    %257 = arith.subf %256, %248 : vector<2x32xf32>
    %258 = arith.mulf %257, %255 : vector<2x32xf32>
    %259 = arith.mulf %248, %225 : vector<2x32xf32>
    %260 = arith.addf %258, %259 : vector<2x32xf32>
    %c12 = arith.constant 12 : index
    %c0_76 = arith.constant 0 : index
    %261 = vector.load %arg4[%c12, %c0_76] : memref<16x32xf32, #tpu.memory_space<vmem>>, vector<2x32xf32>
    tpu.vector_store %arg4[%c12, %c0_76], %260 {strides = array<i32>} : memref<16x32xf32, #tpu.memory_space<vmem>>, vector<2x32xf32>,
    %262 = vector.extract_strided_slice %15 {offsets = [14, 0], sizes = [2, 384], strides = [1, 1]} : vector<16x384xf32> to vector<2x384xf32>
    %cst_77 = arith.constant dense<0.000000e+00> : vector<2x384xf32>
    %263 = tpu.matmul %260, %3, %cst_77 {dimension_numbers = #tpu.dot_dimension_numbers<[1], [0], [0], [1], [0, 0, 1, 1], [], []>} : vector<2x32xf32>, vector<32x384xf32>, vector<2x384xf32> -> vector<2x384xf32>
    %264 = vector.extract_strided_slice %262 {offsets = [0, 0], sizes = [2, 32], strides = [1, 1]} : vector<2x384xf32> to vector<2x32xf32>
    %265 = vector.extract_strided_slice %263 {offsets = [0, 0], sizes = [2, 32], strides = [1, 1]} : vector<2x384xf32> to vector<2x32xf32>
    %266 = arith.addf %264, %265 : vector<2x32xf32>
    %cst_78 = arith.constant 5.000000e-01 : f32
    %267 = vector.broadcast %cst_78 : f32 to vector<2x32xf32>
    %268 = arith.mulf %267, %266 : vector<2x32xf32>
    %269 = math.tanh %268 : vector<2x32xf32>
    %cst_79 = arith.constant 1.000000e+00 : f32
    %270 = vector.broadcast %cst_79 : f32 to vector<2x32xf32>
    %271 = arith.addf %269, %270 : vector<2x32xf32>
    %cst_80 = arith.constant 5.000000e-01 : f32
    %272 = vector.broadcast %cst_80 : f32 to vector<2x32xf32>
    %273 = arith.mulf %272, %271 : vector<2x32xf32>
    %274 = vector.extract_strided_slice %262 {offsets = [0, 128], sizes = [2, 32], strides = [1, 1]} : vector<2x384xf32> to vector<2x32xf32>
    %275 = vector.extract_strided_slice %263 {offsets = [0, 128], sizes = [2, 32], strides = [1, 1]} : vector<2x384xf32> to vector<2x32xf32>
    %276 = arith.addf %274, %275 : vector<2x32xf32>
    %cst_81 = arith.constant 5.000000e-01 : f32
    %277 = vector.broadcast %cst_81 : f32 to vector<2x32xf32>
    %278 = arith.mulf %277, %276 : vector<2x32xf32>
    %279 = math.tanh %278 : vector<2x32xf32>
    %cst_82 = arith.constant 1.000000e+00 : f32
    %280 = vector.broadcast %cst_82 : f32 to vector<2x32xf32>
    %281 = arith.addf %279, %280 : vector<2x32xf32>
    %cst_83 = arith.constant 5.000000e-01 : f32
    %282 = vector.broadcast %cst_83 : f32 to vector<2x32xf32>
    %283 = arith.mulf %282, %281 : vector<2x32xf32>
    %284 = vector.extract_strided_slice %262 {offsets = [0, 256], sizes = [2, 32], strides = [1, 1]} : vector<2x384xf32> to vector<2x32xf32>
    %285 = vector.extract_strided_slice %263 {offsets = [0, 256], sizes = [2, 32], strides = [1, 1]} : vector<2x384xf32> to vector<2x32xf32>
    %286 = vector.broadcast %5 : vector<1x32xf32> to vector<2x32xf32>
    %287 = arith.addf %285, %286 : vector<2x32xf32>
    %288 = arith.mulf %273, %287 : vector<2x32xf32>
    %289 = arith.addf %284, %288 : vector<2x32xf32>
    %290 = math.tanh %289 : vector<2x32xf32>
    %cst_84 = arith.constant 1.000000e+00 : f32
    %291 = vector.broadcast %cst_84 : f32 to vector<2x32xf32>
    %292 = arith.subf %291, %283 : vector<2x32xf32>
    %293 = arith.mulf %292, %290 : vector<2x32xf32>
    %294 = arith.mulf %283, %260 : vector<2x32xf32>
    %295 = arith.addf %293, %294 : vector<2x32xf32>
    %c14 = arith.constant 14 : index
    %c0_85 = arith.constant 0 : index
    %296 = vector.load %arg4[%c14, %c0_85] : memref<16x32xf32, #tpu.memory_space<vmem>>, vector<2x32xf32>
    tpu.vector_store %arg4[%c14, %c0_85], %295 {strides = array<i32>} : memref<16x32xf32, #tpu.memory_space<vmem>>, vector<2x32xf32>,
    %c0_86 = arith.constant 0 : index
    %c0_87 = arith.constant 0 : index
    %297 = vector.load %arg4[%c0_86, %c0_87] : memref<16x32xf32, #tpu.memory_space<vmem>>, vector<16x32xf32>
    %cst_88 = arith.constant dense<0.000000e+00> : vector<16xf32>
    %298 = vector.multi_reduction <add>, %297, %cst_88 [1] : vector<16x32xf32> to vector<16xf32>
    %299 = vector.shape_cast %298 : vector<16xf32> to vector<16x1xf32>
    %cst_89 = arith.constant 3.200000e+01 : f32
    %300 = vector.broadcast %cst_89 : f32 to vector<16x1xf32>
    %301 = arith.divf %299, %300 : vector<16x1xf32>
    %302 = vector.broadcast %301 : vector<16x1xf32> to vector<16x32xf32>
    %303 = arith.subf %297, %302 : vector<16x32xf32>
    %304 = arith.mulf %303, %303 : vector<16x32xf32>
    %cst_90 = arith.constant dense<0.000000e+00> : vector<16xf32>
    %305 = vector.multi_reduction <add>, %304, %cst_90 [1] : vector<16x32xf32> to vector<16xf32>
    %306 = vector.shape_cast %305 : vector<16xf32> to vector<16x1xf32>
    %cst_91 = arith.constant 3.200000e+01 : f32
    %307 = vector.broadcast %cst_91 : f32 to vector<16x1xf32>
    %308 = arith.divf %306, %307 : vector<16x1xf32>
    %309 = vector.broadcast %301 : vector<16x1xf32> to vector<16x32xf32>
    %310 = arith.subf %297, %309 : vector<16x32xf32>
    %cst_92 = arith.constant 9.99999974E-6 : f32
    %311 = vector.broadcast %cst_92 : f32 to vector<16x1xf32>
    %312 = arith.addf %308, %311 : vector<16x1xf32>
    %313 = math.rsqrt %312 : vector<16x1xf32>
    %314 = vector.broadcast %313 : vector<16x1xf32> to vector<16x32xf32>
    %315 = arith.mulf %310, %314 : vector<16x32xf32>
    %cst_93 = arith.constant dense<0.000000e+00> : vector<16x8xf32>
    %316 = tpu.matmul %315, %6, %cst_93 {dimension_numbers = #tpu.dot_dimension_numbers<[1], [0], [0], [1], [0, 0, 1, 1], [], []>} : vector<16x32xf32>, vector<32x8xf32>, vector<16x8xf32> -> vector<16x8xf32>
    %317 = vector.broadcast %7 : vector<1x8xf32> to vector<16x8xf32>
    %318 = arith.addf %316, %317 : vector<16x8xf32>
    %cst_94 = arith.constant 0.000000e+00 : f32
    %319 = vector.broadcast %cst_94 : f32 to vector<16x8xf32>
    %320 = arith.maximumf %318, %319 : vector<16x8xf32>
    %321 = vector.extract_strided_slice %320 {offsets = [0, 0], sizes = [2, 8], strides = [1, 1]} : vector<16x8xf32> to vector<2x8xf32>
    %322 = vector.extract_strided_slice %320 {offsets = [2, 0], sizes = [2, 8], strides = [1, 1]} : vector<16x8xf32> to vector<2x8xf32>
    %323 = arith.addf %321, %322 : vector<2x8xf32>
    %324 = vector.extract_strided_slice %320 {offsets = [4, 0], sizes = [2, 8], strides = [1, 1]} : vector<16x8xf32> to vector<2x8xf32>
    %325 = arith.addf %323, %324 : vector<2x8xf32>
    %326 = vector.extract_strided_slice %320 {offsets = [6, 0], sizes = [2, 8], strides = [1, 1]} : vector<16x8xf32> to vector<2x8xf32>
    %327 = arith.addf %325, %326 : vector<2x8xf32>
    %328 = vector.extract_strided_slice %320 {offsets = [8, 0], sizes = [2, 8], strides = [1, 1]} : vector<16x8xf32> to vector<2x8xf32>
    %329 = arith.addf %327, %328 : vector<2x8xf32>
    %330 = vector.extract_strided_slice %320 {offsets = [10, 0], sizes = [2, 8], strides = [1, 1]} : vector<16x8xf32> to vector<2x8xf32>
    %331 = arith.addf %329, %330 : vector<2x8xf32>
    %332 = vector.extract_strided_slice %320 {offsets = [12, 0], sizes = [2, 8], strides = [1, 1]} : vector<16x8xf32> to vector<2x8xf32>
    %333 = arith.addf %331, %332 : vector<2x8xf32>
    %334 = vector.extract_strided_slice %320 {offsets = [14, 0], sizes = [2, 8], strides = [1, 1]} : vector<16x8xf32> to vector<2x8xf32>
    %335 = arith.addf %333, %334 : vector<2x8xf32>
    %cst_95 = arith.constant 1.250000e-01 : f32
    %336 = vector.broadcast %cst_95 : f32 to vector<2x8xf32>
    %337 = arith.mulf %335, %336 : vector<2x8xf32>
    %c0_96 = arith.constant 0 : index
    %c0_97 = arith.constant 0 : index
    %c0_98 = arith.constant 0 : index
    %338 = vector.load %arg3[%c0_96, %c0_97, %c0_98] : memref<1x2x8xf32, #tpu.memory_space<vmem>>, vector<1x2x8xf32>
    %339 = vector.shape_cast %338 : vector<1x2x8xf32> to vector<2x8xf32>
    %340 = vector.shape_cast %337 : vector<2x8xf32> to vector<1x2x8xf32>
    tpu.vector_store %arg3[%c0_96, %c0_97, %c0_98], %340 {strides = array<i32>} : memref<1x2x8xf32, #tpu.memory_space<vmem>>, vector<1x2x8xf32>,
    return
  }
  func.func @transform_0(%arg0: i32) -> (i32, i32, i32) {
    %c0_i32 = arith.constant 0 : i32
    %c0_i32_0 = arith.constant 0 : i32
    %c0_i32_1 = arith.constant 0 : i32
    return %arg0, %c0_i32, %c0_i32_0 : i32, i32, i32
  }
  func.func @transform_1(%arg0: i32) -> (i32, i32) {
    %c0_i32 = arith.constant 0 : i32
    %c0_i32_0 = arith.constant 0 : i32
    %c0_i32_1 = arith.constant 0 : i32
    return %c0_i32, %c0_i32_0 : i32, i32
  }
  func.func @transform_2(%arg0: i32) -> (i32, i32, i32) {
    %c0_i32 = arith.constant 0 : i32
    %c0_i32_0 = arith.constant 0 : i32
    %c0_i32_1 = arith.constant 0 : i32
    return %arg0, %c0_i32, %c0_i32_0 : i32, i32, i32
  }
}

</mosaic_0001>

<bundles_post_ra>
// kernel: _forward_jit.1
= control target key start
LH: loop header
LB: loop body
LE: loop exit
PB: predicated region body
PF: predicated region fallthrough
CT: control target
= control target key end

     0   :  { %7 = vsyncpa [#allocation4], 0  ;;  %s2626_s0 = inlined_call_operand.hbm [shape: f32[1,16,16], index: 0, kind: input, shape index: {}]   ;;  %s2627_s1 = inlined_call_operand.hbm [shape: f32[176,384], index: 1, kind: input, shape index: {}]   ;;  %s2628_s2 = inlined_call_operand.hbm [shape: f32[1,2,8], index: 2, kind: output, shape index: {}]  }
   0x1   :  { %8 = vsyncpa [#allocation7], 0 }
   0x2   :  { %9 = vsyncpa [#allocation5], 0  ;;  %s2376_s9 = smov [#allocation3]   ;;  %s2304_s13 = scalar_lea.hbm %s2626_s0, 256 }
   0x3   :  { %s15_s10 = sshll.u32 %s2376_s9, 4  ;;  %p2305_p0 = scmp.ne.s32.totalorder %s2626_s0, %s2304_s13  ;;  %s16_s10 = int_to_ptr.vmem [resolvable:$true] %s15_s10 }
   0x4   :  { %p2308_p1 = scmp.lt.u32.totalorder %s2304_s13, %s2626_s0 }
   0x6   :  { %p2310_p2 = pnand %p2308_p1, %p2305_p0 }
   0x8   :  { %2313 = shalt.err (!%p2310_p2)
}
   0x9   :  { %s2314_s18 = scalar_lea.vmem %s16_s10, 256  ;;  %p2319_p4 = scmp.lt.s32.totalorder %s16_s10, %s16_s10 }
   0xa   :  { %p2315_p3 = scmp.ne.s32.totalorder %s16_s10, %s2314_s18  ;;  %p2320_p5 = scmp.lt.s32.totalorder %s2314_s18, %s2314_s18 }
   0xc   :  { %p2321_p6 = por %p2320_p5, %p2319_p4 }
   0xe   :  { %p2322_p7 = pnand %p2321_p6, %p2315_p3 }
  0x10   :  { %2325 = shalt.err (!%p2322_p7)
}
  0x11   :  { %s2377_s19 = smov 128   ;;  %s2378_s20 = smov 8  }
  0x12   :  { %21 = dma.hbm_to_vmem [thread:$0]  %s2626_s0, 256, %s16_s10, [#allocation4], %s2377_s19, %s2377_s19, %s2378_s20  }
  0x13   :  { %s2379_s23 = smov [#allocation6]   ;;  %s2326_s27 = scalar_lea.hbm %s2627_s1, 8448 }
  0x14   :  { %s27_s24 = sshll.u32 %s2379_s23, 4  ;;  %p2327_p8 = scmp.ne.s32.totalorder %s2627_s1, %s2326_s27  ;;  %s28_s24 = int_to_ptr.vmem [resolvable:$true] %s27_s24 }
  0x15   :  { %p2330_p9 = scmp.lt.u32.totalorder %s2326_s27, %s2627_s1 }
  0x17   :  { %p2332_p10 = pnand %p2330_p9, %p2327_p8 }
  0x19   :  { %2335 = shalt.err (!%p2332_p10)
}
  0x1a   :  { %s2336_s4 = scalar_lea.vmem %s28_s24, 8448  ;;  %p2341_p12 = scmp.lt.s32.totalorder %s28_s24, %s28_s24 }
  0x1b   :  { %p2337_p11 = scmp.ne.s32.totalorder %s28_s24, %s2336_s4  ;;  %p2342_p13 = scmp.lt.s32.totalorder %s2336_s4, %s2336_s4 }
  0x1d   :  { %p2343_p0 = por %p2342_p13, %p2341_p12 }
  0x1f   :  { %p2344_p1 = pnand %p2343_p0, %p2337_p11 }
  0x21   :  { %2347 = shalt.err (!%p2344_p1)
}
  0x22   :  { %s2380_s0 = smov 384   ;;  %s2381_s5 = smov 24  }
  0x23   :  { %33 = dma.hbm_to_vmem [thread:$0]  %s2627_s1, 8448, %s28_s24, [#allocation7], %s2380_s0, %s2380_s0, %s2381_s5  }
  0x24   :  { %2370 = dma.done.wait [#allocation4], 256  }
  0x25   :  { %2371 = vsyncadd [#allocation4], 4294967040 }
  0x26   :  { %2372 = dma.done.wait [#allocation7], 8448  }
  0x27   :  { %2373 = vsyncadd [#allocation7], 4294958848  ;;  %vm89_vm0 = vcmask 130048   ;;  %v40_v0 = vld [vmem:[#allocation6] sm:$0xff]  ;;  %v41_v1 = vld [vmem:[#allocation6 + $0x18] sm:$0xff]  ;;  %v2382_v44 = vmov 0.0  }
  0x28   :  { %v87_v2 = vld [vmem:[#allocation3] sm:$0xff]  ;;  %v2086_v3 = vpack.c.bf16 %v41_v1, %v40_v0  ;;  %v47_v5 = vld [vmem:[#allocation6 + $0x68] sm:$0xff]  ;;  %v88_v6 = vld [vmem:[#allocation3 + $0x8] sm:$0xff]  ;;  %258 = vmatprep.mubr.f32.mxu1 %v2382_v44  ;;  %v2383_v45 = vmov 0.0|0.0   ;;  %vm187_vm1 = vcmask 523264   ;;  %vm2384_vm2 = vmmov 0  }
  0x29   :  { %1965 = vmatprep.mubr.msk.f32.mxu0 %vm89_vm0, %v87_v2  ;;  %v44_v4 = vld [vmem:[#allocation6 + $0x50] sm:$0xff]  ;;  %v43_v8 = vld [vmem:[#allocation6 + $0x48] sm:$0xff]  ;;  %v46_v9 = vld [vmem:[#allocation6 + $0x60] sm:$0xff]  ;;  %v172_v2 = vlaneseq  ;;  %vm346_vm3 = vcmask 261120   ;;  %vm509_vm4 = vcmask 254976   ;;  %vm684_vm5 = vcmask 257026  }
  0x2a   :  { %v2090_v7 = vpack.c.bf16 %v47_v5, %v44_v4  ;;  %v45_v10 = vld [vmem:[#allocation6 + $0x58] sm:$0xff]  ;;  %2087 = vmatprep.subr.bf16.mxu0 %v2086_v3  ;;  %v2092_v11 = vpack.c.bf16 %v46_v9, %v43_v8  ;;  %v48_v12 = vld [vmem:[#allocation6 + $0x70] sm:$0xff]  ;;  %v50_v13 = vld [vmem:[#allocation6 + $0x80] sm:$0xff]  ;;  %vm860_vm6 = vcmask 259076   ;;  %vm1036_vm7 = vcmask 261126   ;;  %s2385_s1 = smov [#allocation8]  }
  0x2b   :  { %v53_v14 = vld [vmem:[#allocation6 + $0x98] sm:$0xff]  ;;  %2089 = vmatpush3.bf16.msra.mxu0 %v2086_v3  ;;  %v2106_v15 = vpack.c.bf16 %v48_v12, %v45_v10  ;;  %v52_v18 = vld [vmem:[#allocation6 + $0x90] sm:$0xff]  ;;  %v51_v19 = vld [vmem:[#allocation6 + $0x88] sm:$0xff]  ;;  %v173_v3 = vshrl.u32 %v172_v2, 7  ;;  %s1869_s8 = sshll.u32 %s2385_s1, 4  ;;  %vm1861_vm8 = vcmask 58368   ;;  %s1870_s8 = int_to_ptr.vmem [resolvable:$true] %s1869_s8 }
  0x2c   :  { %2091 = vmatprep.subr.bf16.mxu1 %v2090_v7  ;;  %v2094_v16 = vpack.c.bf16 %v53_v14, %v50_v13  ;;  %v49_v17 = vld [vmem:[#allocation6 + $0x78] sm:$0xff]  ;;  %v54_v21 = vld [vmem:[#allocation6 + $0xa0] sm:$0xff]  ;;  %v56_v22 = vld [vmem:[#allocation6 + $0xb0] sm:$0xff]  ;;  %s2348_s9 = scalar_lea.vmem %s1870_s8, 32  ;;  %p2353_p3 = scmp.lt.s32.totalorder %s1870_s8, %s1870_s8 }
  0x2d   :  { %2093 = vmatpush1.bf16.msra.mxu1 %v2092_v11  ;;  %v2096_v20 = vpack.c.bf16 %v52_v18, %v49_v17  ;;  %v59_v23 = vld [vmem:[#allocation6 + $0xc8] sm:$0xff]  ;;  %2107 = vmatprep.subr.bf16.mxu0 %v2106_v15  ;;  %v2110_v24 = vpack.c.bf16 %v54_v21, %v51_v19  ;;  %v58_v27 = vld [vmem:[#allocation6 + $0xc0] sm:$0xff]  ;;  %v57_v28 = vld [vmem:[#allocation6 + $0xb8] sm:$0xff]  ;;  %v182_v4 = vsub.s32 2, %v173_v3  ;;  %v174_v7 = vsub.s32 0, %v173_v3  ;;  %p2349_p2 = scmp.ne.s32.totalorder %s1870_s8, %s2348_s9  ;;  %p2354_p4 = scmp.lt.s32.totalorder %s2348_s9, %s2348_s9 }
  0x2e   :  { %2095 = vmatprep.subr.bf16.mxu1 %v2094_v16  ;;  %v2098_v25 = vpack.c.bf16 %v59_v23, %v56_v22  ;;  %v55_v26 = vld [vmem:[#allocation6 + $0xa8] sm:$0xff]  ;;  %1966 = vmatmul.mubr.msk.f32.vlgmr.msra.gmra.mrb[0].mxu0 %vm89_vm0, %v88_v6  ;;  %v60_v29 = vld [vmem:[#allocation6 + $0xd0] sm:$0xff]  ;;  %v62_v30 = vld [vmem:[#allocation6 + $0xe0] sm:$0xff]  ;;  %v178_v9 = vsub.s32 1, %v173_v3 }
  0x2f   :  { %v65_v31 = vld [vmem:[#allocation6 + $0xf8] sm:$0xff]  ;;  %2109 = vmatpush3.bf16.msra.mxu0 %v2106_v15  ;;  %v2100_v32 = vpack.c.bf16 %v58_v27, %v55_v26  ;;  %v2114_v33 = vpack.c.bf16 %v60_v29, %v57_v28  ;;  %v64_v36 = vld [vmem:[#allocation6 + $0xf0] sm:$0xff]  ;;  %v63_v37 = vld [vmem:[#allocation6 + $0xe8] sm:$0xff]  ;;  %p2355_p5 = por %p2354_p4, %p2353_p3 }
  0x30   :  { %2111 = vmatprep.subr.bf16.mxu0 %v2110_v24  ;;  %v2102_v34 = vpack.c.bf16 %v65_v31, %v62_v30  ;;  %v61_v35 = vld [vmem:[#allocation6 + $0xd8] sm:$0xff]  ;;  %v66_v39 = vld [vmem:[#allocation6 + $0x100] sm:$0xff]  ;;  %v68_v41 = vld [vmem:[#allocation6 + $0x110] sm:$0xff] }
  0x31   :  { %2097 = vmatpush1.bf16.msra.mxu1 %v2096_v20  ;;  %v2104_v38 = vpack.c.bf16 %v64_v36, %v61_v35  ;;  %v2118_v40 = vpack.c.bf16 %v66_v39, %v63_v37  ;;  %v71_v42 = vld [vmem:[#allocation6 + $0x128] sm:$0xff]  ;;  %v70_v47 = vld [vmem:[#allocation6 + $0x120] sm:$0xff]  ;;  %v42_v48 = vld [vmem:[#allocation6 + $0x30] ss:$0 sm:$0xff]  ;;  %p2356_p6 = pnand %p2355_p5, %p2349_p2 }
  0x32   :  { %2099 = vmatprep.subr.bf16.mxu1 %v2098_v25  ;;  %v2427_v43 = vpack.c.bf16 %v71_v42, %v68_v41  ;;  %v67_v46 = vld [vmem:[#allocation6 + $0x108] sm:$0xff]  ;;  %v74_v49 = vld [vmem:[#allocation6 + $0x140] sm:$0xff]  ;;  %v77_v50 = vld [vmem:[#allocation6 + $0x158] sm:$0xff] }
  0x33   :  { %2113 = vmatpush3.bf16.msra.mxu0 %v2110_v24  ;;  %v69_v52 = vld [vmem:[#allocation6 + $0x118] sm:$0xff]  ;;  %v72_v53 = vld [vmem:[#allocation6 + $0x130] sm:$0xff]  ;;  %v2432_v55 = vpack.c.bf16 %v70_v47, %v67_v46  ;;  %v2434_v57 = vpack.c.bf16 %v77_v50, %v74_v49  ;;  %v75_v62 = vld [vmem:[#allocation6 + $0x148] sm:$0xff] }
  0x34   :  { %2115 = vmatprep.subr.bf16.mxu0 %v2114_v33  ;;  %v73_v58 = vld [vmem:[#allocation6 + $0x138] sm:$0xff]  ;;  %v76_v59 = vld [vmem:[#allocation6 + $0x150] sm:$0xff]  ;;  %v2436_v61 = vpack.c.bf16 %v72_v53, %v69_v52  ;;  %v78_v63 = vld [vmem:[#allocation6 + $0x160] sm:$0xff] }
  0x35   :  { %2101 = vmatpush1.bf16.msra.mxu1 %v2100_v32  ;;  %v2442_v0 = vpack.c.bf16 %v76_v59, %v73_v58  ;;  %v2447_v1 = vpack.c.bf16 %v78_v63, %v75_v62  ;;  %v80_v5 = vld [vmem:[#allocation6 + $0x168] ss:$8 sm:$0x7]  ;;  %v2483_v30 = vld [vmem:[#allocation6 + $0x180] ss:$0 sm:$0xff] }
  0x36   :  { %2103 = vmatprep.subr.bf16.mxu1 %v2102_v34  ;;  %v183_v6 = vrot.slane %v80_v5, %v182_v4  ;;  %v175_v14 = vrot.slane %v80_v5, %v174_v7  ;;  %v179_v15 = vrot.slane %v80_v5, %v178_v9 }
  0x37   :  { %2117 = vmatpush3.bf16.msra.mxu0 %v2114_v33 }
  0x38   :  { %2119 = vmatprep.subr.bf16.mxu0 %v2118_v40 }
  0x39   :  { %2105 = vmatpush1.bf16.msra.mxu1 %v2104_v38 }
  0x3a   :  { %2123 = vmatprep.subr.bf16.mxu1 %v2427_v43 }
  0x3b   :  { %2121 = vmatpush3.bf16.msra.mxu0 %v2118_v40 }
  0x3c   :  { %2130 = vmatprep.subr.bf16.mxu0 %v2383_v45 }
 0x101   :  { %v1967_v51 = vpop.f32.mrb[0].mxu0 }
 0x102   :  { %v162_v54 = vpop.f32.mrb[1].mxu0  ;;  %v168_v60 = vadd.f32 %v1967_v51, %v42_v48 }
 0x103   :  { %v163_v56 = vadd.f32 %v162_v54, %v42_v48 }
 0x105   :  { %1881 = vmatmul.mubr.msk.f32.vlgmr.msra.gmra.mrb[0].mxu1 %vm187_vm1, %v163_v56  ;;  %1984 = vmatprep.mubr.msk.f32.mxu0 %vm187_vm1, %v163_v56 }
 0x106   :  { %2125 = vmatpush1.bf16.msra.mxu1 %v2432_v55  ;;  %1985 = vmatmul.mubr.msk.f32.vlgmr.msra.gmra.mrb[2].mxu0 %vm187_vm1, %v168_v60 }
 0x107   :  { %264 = vmatprep.mubr.f32.mxu1 %v2382_v44  ;;  %2127 = vmatprep.subr.bf16.mxu1 %v2434_v57 }
 0x108   :  { %2132 = vmatpush3.bf16.msra.mxu0 %v2436_v61  ;;  %1995 = vmatprep.mubr.msk.f32.mxu0 %vm2384_vm2, %v2382_v44 }
 0x109   :  { %1882 = vmatmul.mubr.msk.f32.gmra.mrb[2].mxu1 %vm187_vm1, %v168_v60  ;;  %2133 = vmatprep.subr.bf16.mxu0 %v2383_v45 }
 0x10a   :  { %2129 = vmatpush1.bf16.msra.mxu1 %v2442_v0  ;;  %414 = vmatprep.mubr.f32.mxu1 %v2382_v44 }
 0x10b   :  { %2137 = vmatprep.subr.bf16.mxu1 %v2427_v43 }
 0x10c   :  { %2135 = vmatpush3.bf16.msra.mxu0 %v2447_v1 }
 0x10d   :  { %415 = vmatmul.mubr.f32.vlgmr.msra.gmra.mrb[4].mxu1 %v2382_v44  ;;  %2144 = vmatprep.subr.bf16.mxu0 %v2383_v45 }
 0x10e   :  { %2139 = vmatpush1.bf16.msra.mxu1 %v2432_v55  ;;  %578 = vmatprep.mubr.f32.mxu1 %v2382_v44 }
 0x10f   :  { %1996 = vmatmul.mubr.f32.vlgmr.msra.gmra.mrb[4].mxu0 %v2382_v44  ;;  %2141 = vmatprep.subr.bf16.mxu1 %v2434_v57 }
 0x110   :  { %2146 = vmatpush3.bf16.msra.mxu0 %v2436_v61  ;;  %2006 = vmatprep.mubr.msk.f32.mxu0 %vm2384_vm2, %v2382_v44 }
 0x111   :  { %2147 = vmatprep.subr.bf16.mxu0 %v2383_v45 }
 0x112   :  { %2143 = vmatpush1.bf16.msra.mxu1 %v2442_v0 }
 0x113   :  { %2151 = vmatprep.subr.bf16.mxu1 %v2427_v43 }
 0x114   :  { %2149 = vmatpush3.bf16.msra.mxu0 %v2447_v1 }
 0x115   :  { %2158 = vmatprep.subr.bf16.mxu0 %v2383_v45 }
 0x1d8   :  { %v260_v8 = vpop.f32.mrb[0].mxu1 }
 0x1d9   :  { %v262_v10 = vpop.f32.mrb[1].mxu1  ;;  %v1986_v11 = vpop.f32.mrb[2].mxu0  ;;  %v2477_v20 = vadd.f32 %v260_v8, %v175_v14 }
 0x1da   :  { %v2471_v12 = vadd.f32 %v1986_v11, %v183_v6  ;;  %v337_v13 = vpop.f32.mrb[3].mxu0  ;;  %v2480_v24 = vadd.f32 %v262_v10, %v179_v15 }
 0x1db   :  { %v2486_v35 = vadd.f32 %v337_v13, %v183_v6 }
 0x1dc   :  { %v266_v16 = vpop.f32.mrb[2].mxu1 }
 0x1dd   :  { %v2473_v17 = vadd.f32 %v266_v16, %v175_v14  ;;  %v268_v18 = vpop.f32.mrb[3].mxu1 }
 0x1de   :  { %v2475_v19 = vadd.f32 %v268_v18, %v179_v15 }
 0x1e0   :  { %v416_v21 = vpop.f32.mrb[4].mxu1 }
 0x1e1   :  { %v491_v22 = vadd.f32 %v416_v21, %v2477_v20  ;;  %v418_v23 = vpop.f32.mrb[5].mxu1 }
 0x1e2   :  { %v487_v25 = vpop.f32.mrb[4].mxu0  ;;  %v496_v28 = vadd.f32 %v418_v23, %v2480_v24 }
 0x1e3   :  { %v492_v26 = vmul.f32 0.5, %v491_v22  ;;  %v1997_v27 = vpop.f32.mrb[5].mxu0  ;;  %v501_v33 = vadd.f32 %v487_v25, %v2483_v30 }
 0x1e4   :  { %v497_v29 = vmul.f32 0.5, %v496_v28 }
 0x1e5   :  { %2252 = vtanh.f32 %v492_v26 }
 0x1e6   :  { %2254 = vtanh.f32 %v497_v29 }
 0x1ef   :  { %v2253_v31 = vpop.eup %2252 }
 0x1f0   :  { %v494_v32 = vadd.f32 1.0, %v2253_v31  ;;  %v2255_v37 = vpop.eup %2254 }
 0x1f1   :  { %v499_v39 = vadd.f32 1.0, %v2255_v37 }
 0x1f2   :  { %v495_v34 = vmul.f32 0.5, %v494_v32 }
 0x1f3   :  { %v500_v40 = vmul.f32 0.5, %v499_v39 }
 0x1f4   :  { %v502_v36 = vmul.f32 %v501_v33, %v495_v34 }
 0x1f5   :  { %v505_v41 = vsub.f32 1.0, %v500_v40  ;;  %v507_v46 = vmul.f32 0.0, %v500_v40 }
 0x1f6   :  { %v503_v38 = vadd.f32 %v502_v36, %v2486_v35 }
 0x1f8   :  { %2256 = vtanh.f32 %v503_v38 }
 0x202   :  { %v2257_v42 = vpop.eup %2256 }
 0x203   :  { %v506_v47 = vmul.f32 %v2257_v42, %v505_v41 }
 0x205   :  { %v508_v48 = vadd.f32 %v507_v46, %v506_v47 }
 0x207   :  { %510 = vst.msk [vmem:[#allocation2] sm:$0x3] %vm509_vm4, %v508_v48  ;;  %1885 = vmatmul.mubr.msk.f32.vlgmr.msra.gmra.mrb[6].mxu1 %vm346_vm3, %v508_v48  ;;  %2007 = vmatmul.mubr.msk.f32.vlgmr.msra.gmra.mrb[6].mxu0 %vm346_vm3, %v508_v48  ;;  %v680_v8 = vrot.slane %v508_v48, 6 }
 0x208   :  { %2153 = vmatpush1.bf16.msra.mxu1 %v2432_v55  ;;  %2160 = vmatpush3.bf16.msra.mxu0 %v2436_v61 }
 0x209   :  { %2155 = vmatprep.subr.bf16.mxu1 %v2434_v57  ;;  %2161 = vmatprep.subr.bf16.mxu0 %v2383_v45 }
 0x20a   :  { %754 = vmatprep.mubr.f32.mxu1 %v2382_v44  ;;  %2017 = vmatprep.mubr.msk.f32.mxu0 %vm2384_vm2, %v2382_v44 }
 0x20c   :  { %2157 = vmatpush1.bf16.msra.mxu1 %v2442_v0  ;;  %2163 = vmatpush3.bf16.msra.mxu0 %v2447_v1 }
 0x20d   :  { %2165 = vmatprep.subr.bf16.mxu1 %v2427_v43  ;;  %2172 = vmatprep.subr.bf16.mxu0 %v2383_v45 }
 0x2da   :  { %v580_v49 = vpop.f32.mrb[6].mxu1  ;;  %v651_v50 = vpop.f32.mrb[6].mxu0 }
 0x2db   :  { %v656_v51 = vrot.slane %v580_v49, 6  ;;  %v582_v52 = vpop.f32.mrb[7].mxu1  ;;  %v2008_v53 = vpop.f32.mrb[7].mxu0  ;;  %v671_v62 = vadd.f32 %v651_v50, %v2483_v30 }
 0x2dc   :  { %v664_v54 = vrot.slane %v582_v52, 6 }
 0x2dd   :  { %v658_v56 = vadd.f32 %v656_v51, %v2477_v20  ;;  %v673_v6 = vrot.slane %v671_v62, 6 }
 0x2de   :  { %v666_v58 = vadd.f32 %v664_v54, %v2480_v24 }
 0x2df   :  { %v659_v59 = vmul.f32 0.5, %v658_v56 }
 0x2e0   :  { %v667_v60 = vmul.f32 0.5, %v666_v58 }
 0x2e1   :  { %2258 = vtanh.f32 %v659_v59 }
 0x2e2   :  { %2260 = vtanh.f32 %v667_v60 }
 0x2eb   :  { %v2259_v63 = vpop.eup %2258 }
 0x2ec   :  { %v2261_v2 = vpop.eup %2260  ;;  %v661_v3 = vadd.f32 1.0, %v2259_v63 }
 0x2ed   :  { %v669_v4 = vadd.f32 1.0, %v2261_v2 }
 0x2ee   :  { %v662_v5 = vmul.f32 0.5, %v661_v3 }
 0x2ef   :  { %v670_v7 = vmul.f32 0.5, %v669_v4 }
 0x2f0   :  { %v675_v9 = vmul.f32 %v673_v6, %v662_v5 }
 0x2f1   :  { %v682_v10 = vmul.f32 %v680_v8, %v670_v7  ;;  %v678_v13 = vsub.f32 1.0, %v670_v7 }
 0x2f2   :  { %v676_v11 = vadd.f32 %v675_v9, %v2486_v35 }
 0x2f4   :  { %2262 = vtanh.f32 %v676_v11 }
 0x2fe   :  { %v2263_v14 = vpop.eup %2262 }
 0x2ff   :  { %v679_v15 = vmul.f32 %v2263_v14, %v678_v13 }
 0x301   :  { %v683_v16 = vadd.f32 %v682_v10, %v679_v15 }
 0x303   :  { %685 = vst.msk [vmem:[#allocation2] sm:$0xc] %vm684_vm5, %v683_v16  ;;  %v687_v18 = vrot.slane %v683_v16, 2  ;;  %v856_v42 = vrot.slane %v683_v16, 6 }
 0x305   :  { %1887 = vmatmul.mubr.msk.f32.vlgmr.msra.gmra.mrb[8].mxu1 %vm346_vm3, %v687_v18  ;;  %2018 = vmatmul.mubr.msk.f32.vlgmr.msra.gmra.mrb[8].mxu0 %vm346_vm3, %v687_v18 }
 0x306   :  { %2167 = vmatpush1.bf16.msra.mxu1 %v2432_v55  ;;  %2174 = vmatpush3.bf16.msra.mxu0 %v2436_v61 }
 0x307   :  { %2169 = vmatprep.subr.bf16.mxu1 %v2434_v57  ;;  %2175 = vmatprep.subr.bf16.mxu0 %v2383_v45 }
 0x308   :  { %930 = vmatprep.mubr.f32.mxu1 %v2382_v44  ;;  %2028 = vmatprep.mubr.msk.f32.mxu0 %vm2384_vm2, %v2382_v44 }
 0x30a   :  { %2171 = vmatpush1.bf16.msra.mxu1 %v2442_v0  ;;  %2177 = vmatpush3.bf16.msra.mxu0 %v2447_v1 }
 0x30b   :  { %2179 = vmatprep.subr.bf16.mxu1 %v2427_v43  ;;  %2186 = vmatprep.subr.bf16.mxu0 %v2383_v45 }
 0x3d8   :  { %v756_v21 = vpop.f32.mrb[8].mxu1  ;;  %v827_v22 = vpop.f32.mrb[8].mxu0 }
 0x3d9   :  { %v832_v23 = vrot.slane %v756_v21, 4  ;;  %v758_v25 = vpop.f32.mrb[9].mxu1  ;;  %v2019_v26 = vpop.f32.mrb[9].mxu0  ;;  %v847_v33 = vadd.f32 %v827_v22, %v2483_v30 }
 0x3da   :  { %v840_v27 = vrot.slane %v758_v25, 4 }
 0x3db   :  { %v834_v28 = vadd.f32 %v832_v23, %v2477_v20  ;;  %v849_v40 = vrot.slane %v847_v33, 4 }
 0x3dc   :  { %v842_v29 = vadd.f32 %v840_v27, %v2480_v24 }
 0x3dd   :  { %v835_v31 = vmul.f32 0.5, %v834_v28 }
 0x3de   :  { %v843_v32 = vmul.f32 0.5, %v842_v29 }
 0x3df   :  { %2264 = vtanh.f32 %v835_v31 }
 0x3e0   :  { %2266 = vtanh.f32 %v843_v32 }
 0x3e9   :  { %v2265_v34 = vpop.eup %2264 }
 0x3ea   :  { %v2267_v36 = vpop.eup %2266  ;;  %v837_v37 = vadd.f32 1.0, %v2265_v34 }
 0x3eb   :  { %v845_v38 = vadd.f32 1.0, %v2267_v36 }
 0x3ec   :  { %v838_v39 = vmul.f32 0.5, %v837_v37 }
 0x3ed   :  { %v846_v41 = vmul.f32 0.5, %v845_v38 }
 0x3ee   :  { %v851_v46 = vmul.f32 %v849_v40, %v838_v39 }
 0x3ef   :  { %v858_v47 = vmul.f32 %v856_v42, %v846_v41  ;;  %v854_v49 = vsub.f32 1.0, %v846_v41 }
 0x3f0   :  { %v852_v48 = vadd.f32 %v851_v46, %v2486_v35 }
 0x3f2   :  { %2268 = vtanh.f32 %v852_v48 }
 0x3fc   :  { %v2269_v50 = vpop.eup %2268 }
 0x3fd   :  { %v855_v51 = vmul.f32 %v2269_v50, %v854_v49 }
 0x3ff   :  { %v859_v52 = vadd.f32 %v858_v47, %v855_v51 }
 0x401   :  { %861 = vst.msk [vmem:[#allocation2] sm:$0x30] %vm860_vm6, %v859_v52  ;;  %v863_v53 = vrot.slane %v859_v52, 4  ;;  %v1032_v14 = vrot.slane %v859_v52, 6 }
 0x403   :  { %1889 = vmatmul.mubr.msk.f32.vlgmr.msra.gmra.mrb[10].mxu1 %vm346_vm3, %v863_v53  ;;  %2029 = vmatmul.mubr.msk.f32.vlgmr.msra.gmra.mrb[10].mxu0 %vm346_vm3, %v863_v53 }
 0x404   :  { %2181 = vmatpush1.bf16.msra.mxu1 %v2432_v55  ;;  %2188 = vmatpush3.bf16.msra.mxu0 %v2436_v61 }
 0x405   :  { %2183 = vmatprep.subr.bf16.mxu1 %v2434_v57  ;;  %2189 = vmatprep.subr.bf16.mxu0 %v2383_v45 }
 0x406   :  { %1106 = vmatprep.mubr.f32.mxu1 %v2382_v44  ;;  %2039 = vmatprep.mubr.msk.f32.mxu0 %vm2384_vm2, %v2382_v44 }
 0x408   :  { %2185 = vmatpush1.bf16.msra.mxu1 %v2442_v0  ;;  %2191 = vmatpush3.bf16.msra.mxu0 %v2447_v1 }
 0x409   :  { %2193 = vmatprep.subr.bf16.mxu1 %v2427_v43  ;;  %2200 = vmatprep.subr.bf16.mxu0 %v2383_v45 }
 0x4d6   :  { %v932_v54 = vpop.f32.mrb[10].mxu1  ;;  %v1003_v56 = vpop.f32.mrb[10].mxu0 }
 0x4d7   :  { %v1008_v58 = vrot.slane %v932_v54, 2  ;;  %v934_v59 = vpop.f32.mrb[11].mxu1  ;;  %v2030_v60 = vpop.f32.mrb[11].mxu0  ;;  %v1023_v5 = vadd.f32 %v1003_v56, %v2483_v30 }
 0x4d8   :  { %v1016_v62 = vrot.slane %v934_v59, 2 }
 0x4d9   :  { %v1010_v63 = vadd.f32 %v1008_v58, %v2477_v20  ;;  %v1025_v11 = vrot.slane %v1023_v5, 2 }
 0x4da   :  { %v1018_v2 = vadd.f32 %v1016_v62, %v2480_v24 }
 0x4db   :  { %v1011_v3 = vmul.f32 0.5, %v1010_v63 }
 0x4dc   :  { %v1019_v4 = vmul.f32 0.5, %v1018_v2 }
 0x4dd   :  { %2270 = vtanh.f32 %v1011_v3 }
 0x4de   :  { %2272 = vtanh.f32 %v1019_v4 }
 0x4e7   :  { %v2271_v6 = vpop.eup %2270 }
 0x4e8   :  { %v2273_v7 = vpop.eup %2272  ;;  %v1013_v8 = vadd.f32 1.0, %v2271_v6 }
 0x4e9   :  { %v1021_v9 = vadd.f32 1.0, %v2273_v7 }
 0x4ea   :  { %v1014_v10 = vmul.f32 0.5, %v1013_v8 }
 0x4eb   :  { %v1022_v13 = vmul.f32 0.5, %v1021_v9 }
 0x4ec   :  { %v1027_v15 = vmul.f32 %v1025_v11, %v1014_v10 }
 0x4ed   :  { %v1034_v16 = vmul.f32 %v1032_v14, %v1022_v13  ;;  %v1030_v24 = vsub.f32 1.0, %v1022_v13 }
 0x4ee   :  { %v1028_v20 = vadd.f32 %v1027_v15, %v2486_v35 }
 0x4f0   :  { %2274 = vtanh.f32 %v1028_v20 }
 0x4fa   :  { %v2275_v18 = vpop.eup %2274 }
 0x4fb   :  { %v1031_v21 = vmul.f32 %v2275_v18, %v1030_v24 }
 0x4fd   :  { %v1035_v22 = vadd.f32 %v1034_v16, %v1031_v21 }
 0x4ff   :  { %1037 = vst.msk [vmem:[#allocation2] sm:$0xc0] %vm1036_vm7, %v1035_v22  ;;  %v1039_v23 = vrot.slane %v1035_v22, 6 }
 0x501   :  { %1891 = vmatmul.mubr.msk.f32.vlgmr.msra.gmra.mrb[12].mxu1 %vm346_vm3, %v1039_v23  ;;  %2040 = vmatmul.mubr.msk.f32.vlgmr.msra.gmra.mrb[12].mxu0 %vm346_vm3, %v1039_v23 }
 0x502   :  { %2195 = vmatpush1.bf16.msra.mxu1 %v2432_v55  ;;  %2202 = vmatpush3.bf16.msra.mxu0 %v2436_v61 }
 0x503   :  { %2197 = vmatprep.subr.bf16.mxu1 %v2434_v57  ;;  %2203 = vmatprep.subr.bf16.mxu0 %v2383_v45 }
 0x504   :  { %1270 = vmatprep.mubr.f32.mxu1 %v2382_v44  ;;  %2050 = vmatprep.mubr.msk.f32.mxu0 %vm2384_vm2, %v2382_v44 }
 0x506   :  { %v1727_v35 = vld [vmem:[#allocation2] sm:$0xff]  ;;  %2199 = vmatpush1.bf16.msra.mxu1 %v2442_v0  ;;  %2205 = vmatpush3.bf16.msra.mxu0 %v2447_v1 }
 0x507   :  { %v1729_v25 = vsel %vm346_vm3, %v1727_v35, 0.0  ;;  %2207 = vmatprep.subr.bf16.mxu1 %v2427_v43  ;;  %2214 = vmatprep.subr.bf16.mxu0 %v2383_v45 }
 0x508   :  { %1730 = vadd.xlane.f32.xlu0 %v1729_v25 }
 0x595   :  { %v1731_v26 = vpop.xlane.xlu0 %1730 }
 0x596   :  { %v1736_v27 = vmul.f32 0.03125, %v1731_v26 }
 0x598   :  { %v2558_v28 = vsub.f32 %v1727_v35, %v1736_v27 }
 0x59a   :  { %v1740_v29 = vmul.f32 %v2558_v28, %v2558_v28 }
 0x59c   :  { %v1742_v31 = vsel %vm346_vm3, %v1740_v29, 0.0 }
 0x59d   :  { %1743 = vadd.xlane.f32.xlu1 %v1742_v31 }
 0x5d4   :  { %v1108_v32 = vpop.f32.mrb[12].mxu1  ;;  %v1179_v33 = vpop.f32.mrb[12].mxu0 }
 0x5d5   :  { %v1183_v34 = vadd.f32 %v1108_v32, %v2473_v17  ;;  %v1110_v36 = vpop.f32.mrb[13].mxu1  ;;  %v2041_v37 = vpop.f32.mrb[13].mxu0  ;;  %v1193_v47 = vadd.f32 %v1179_v33, %v2483_v30 }
 0x5d6   :  { %v1188_v39 = vadd.f32 %v1110_v36, %v2475_v19 }
 0x5d7   :  { %v1184_v38 = vmul.f32 0.5, %v1183_v34 }
 0x5d8   :  { %v1189_v40 = vmul.f32 0.5, %v1188_v39 }
 0x5d9   :  { %2276 = vtanh.f32 %v1184_v38 }
 0x5da   :  { %2278 = vtanh.f32 %v1189_v40 }
 0x5e3   :  { %v2277_v41 = vpop.eup %2276 }
 0x5e4   :  { %v1186_v42 = vadd.f32 1.0, %v2277_v41  ;;  %v2279_v49 = vpop.eup %2278 }
 0x5e5   :  { %v1191_v51 = vadd.f32 1.0, %v2279_v49 }
 0x5e6   :  { %v1187_v46 = vmul.f32 0.5, %v1186_v42 }
 0x5e7   :  { %v1192_v52 = vmul.f32 0.5, %v1191_v51 }
 0x5e8   :  { %v1194_v48 = vmul.f32 %v1193_v47, %v1187_v46 }
 0x5e9   :  { %v1197_v53 = vsub.f32 1.0, %v1192_v52  ;;  %v1200_v58 = vmul.f32 %v1192_v52, %v1039_v23 }
 0x5ea   :  { %v1195_v50 = vadd.f32 %v1194_v48, %v2471_v12 }
 0x5ec   :  { %2280 = vtanh.f32 %v1195_v50 }
 0x5f6   :  { %v2281_v54 = vpop.eup %2280 }
 0x5f7   :  { %v1198_v56 = vmul.f32 %v2281_v54, %v1197_v53 }
 0x5f9   :  { %v1201_v59 = vadd.f32 %v1200_v58, %v1198_v56 }
 0x5fb   :  { %1202 = vst.msk [vmem:[#allocation2 + $0x8] sm:$0x3] %vm509_vm4, %v1201_v59  ;;  %1893 = vmatmul.mubr.msk.f32.vlgmr.msra.gmra.mrb[14].mxu1 %vm346_vm3, %v1201_v59  ;;  %2051 = vmatmul.mubr.msk.f32.vlgmr.msra.gmra.mrb[14].mxu0 %vm346_vm3, %v1201_v59  ;;  %v1372_v20 = vrot.slane %v1201_v59, 6 }
 0x5fc   :  { %2209 = vmatpush1.bf16.msra.mxu1 %v2432_v55  ;;  %2216 = vmatpush3.bf16.msra.mxu0 %v2436_v61 }
 0x5fd   :  { %2211 = vmatprep.subr.bf16.mxu1 %v2434_v57  ;;  %2217 = vmatprep.subr.bf16.mxu0 %v2383_v45 }
 0x5fe   :  { %1445 = vmatprep.mubr.f32.mxu1 %v2382_v44  ;;  %2061 = vmatprep.mubr.msk.f32.mxu0 %vm2384_vm2, %v2382_v44 }
 0x600   :  { %2213 = vmatpush1.bf16.msra.mxu1 %v2442_v0  ;;  %2219 = vmatpush3.bf16.msra.mxu0 %v2447_v1 }
 0x601   :  { %2221 = vmatprep.subr.bf16.mxu1 %v2427_v43  ;;  %2228 = vmatprep.subr.bf16.mxu0 %v2383_v45 }
 0x62a   :  { %v1744_v37 = vpop.xlane.xlu1 %1743 }
 0x62b   :  { %v1748_v41 = vmul.f32 0.03125, %v1744_v37 }
 0x62d   :  { %v1750_v50 = vadd.f32 1e-05, %v1748_v41 }
 0x6ce   :  { %v1272_v60 = vpop.f32.mrb[14].mxu1  ;;  %v1343_v62 = vpop.f32.mrb[14].mxu0 }
 0x6cf   :  { %v1348_v63 = vrot.slane %v1272_v60, 6  ;;  %v1274_v2 = vpop.f32.mrb[15].mxu1  ;;  %v2052_v3 = vpop.f32.mrb[15].mxu0  ;;  %v1363_v9 = vadd.f32 %v1343_v62, %v2483_v30 }
 0x6d0   :  { %v1356_v4 = vrot.slane %v1274_v2, 6 }
 0x6d1   :  { %v1350_v5 = vadd.f32 %v1348_v63, %v2473_v17  ;;  %v1365_v15 = vrot.slane %v1363_v9, 6 }
 0x6d2   :  { %v1358_v6 = vadd.f32 %v1356_v4, %v2475_v19 }
 0x6d3   :  { %v1351_v7 = vmul.f32 0.5, %v1350_v5 }
 0x6d4   :  { %v1359_v8 = vmul.f32 0.5, %v1358_v6 }
 0x6d5   :  { %2282 = vtanh.f32 %v1351_v7 }
 0x6d6   :  { %2284 = vtanh.f32 %v1359_v8 }
 0x6df   :  { %v2283_v10 = vpop.eup %2282 }
 0x6e0   :  { %v2285_v43 = vpop.eup %2284  ;;  %v1353_v11 = vadd.f32 1.0, %v2283_v10 }
 0x6e1   :  { %v1361_v13 = vadd.f32 1.0, %v2285_v43 }
 0x6e2   :  { %v1354_v14 = vmul.f32 0.5, %v1353_v11 }
 0x6e3   :  { %v1362_v16 = vmul.f32 0.5, %v1361_v13 }
 0x6e4   :  { %v1367_v24 = vmul.f32 %v1365_v15, %v1354_v14 }
 0x6e5   :  { %v1374_v18 = vmul.f32 %v1372_v20, %v1362_v16  ;;  %v1370_v22 = vsub.f32 1.0, %v1362_v16 }
 0x6e6   :  { %v1368_v21 = vadd.f32 %v1367_v24, %v2471_v12 }
 0x6e8   :  { %2286 = vtanh.f32 %v1368_v21 }
 0x6f2   :  { %v2287_v23 = vpop.eup %2286 }
 0x6f3   :  { %v1371_v35 = vmul.f32 %v2287_v23, %v1370_v22 }
 0x6f5   :  { %v1375_v25 = vadd.f32 %v1374_v18, %v1371_v35 }
 0x6f7   :  { %1376 = vst.msk [vmem:[#allocation2 + $0x8] sm:$0xc] %vm684_vm5, %v1375_v25  ;;  %v1378_v26 = vrot.slane %v1375_v25, 2  ;;  %v1547_v46 = vrot.slane %v1375_v25, 6 }
 0x6f9   :  { %1895 = vmatmul.mubr.msk.f32.vlgmr.msra.gmra.mrb[16].mxu1 %vm346_vm3, %v1378_v26  ;;  %2062 = vmatmul.mubr.msk.f32.vlgmr.msra.gmra.mrb[16].mxu0 %vm346_vm3, %v1378_v26 }
 0x6fa   :  { %2223 = vmatpush1.bf16.msra.mxu1 %v2432_v55  ;;  %2230 = vmatpush3.bf16.msra.mxu0 %v2436_v61 }
 0x6fb   :  { %2225 = vmatprep.subr.bf16.mxu1 %v2434_v57  ;;  %2231 = vmatprep.subr.bf16.mxu0 %v2383_v45 }
 0x6fc   :  { %1620 = vmatprep.mubr.f32.mxu1 %v2382_v44  ;;  %2072 = vmatprep.mubr.msk.f32.mxu0 %vm2384_vm2, %v2382_v44 }
 0x6fe   :  { %2227 = vmatpush1.bf16.msra.mxu1 %v2442_v0  ;;  %2233 = vmatpush3.bf16.msra.mxu0 %v2447_v1 }
 0x7cc   :  { %v1447_v27 = vpop.f32.mrb[16].mxu1  ;;  %v1518_v29 = vpop.f32.mrb[16].mxu0 }
 0x7cd   :  { %v1523_v31 = vrot.slane %v1447_v27, 4  ;;  %v1449_v32 = vpop.f32.mrb[17].mxu1  ;;  %v2063_v55 = vpop.f32.mrb[17].mxu0  ;;  %v1538_v44 = vadd.f32 %v1518_v29, %v2483_v30 }
 0x7ce   :  { %v1531_v33 = vrot.slane %v1449_v32, 4  ;;  %v84_v55 = vld [vmem:[#allocation6 + $0x1c8] sm:$0xff] }
 0x7cf   :  { %v1525_v61 = vadd.f32 %v1523_v31, %v2473_v17  ;;  %v1540_v40 = vrot.slane %v1538_v44, 4  ;;  %v82_v31 = vld [vmem:[#allocation6 + $0x198] sm:$0xff] }
 0x7d0   :  { %v1533_v57 = vadd.f32 %v1531_v33, %v2475_v19  ;;  %v85_v33 = vld [vmem:[#allocation6 + $0x1e0] sm:$0xff] }
 0x7d1   :  { %v1526_v45 = vmul.f32 0.5, %v1525_v61  ;;  %v2238_v61 = vpack.c.bf16 %v85_v33, %v84_v55 }
 0x7d2   :  { %v1534_v34 = vmul.f32 0.5, %v1533_v57 }
 0x7d3   :  { %2288 = vtanh.f32 %v1526_v45 }
 0x7d4   :  { %2290 = vtanh.f32 %v1534_v34 }
 0x7dd   :  { %v2289_v36 = vpop.eup %2288 }
 0x7de   :  { %v2291_v0 = vpop.eup %2290  ;;  %v1528_v1 = vadd.f32 1.0, %v2289_v36 }
 0x7df   :  { %v1536_v38 = vadd.f32 1.0, %v2291_v0  ;;  %v86_v0 = vld [vmem:[#allocation6 + $0x1f8] ss:$0 sm:$0xff] }
 0x7e0   :  { %v1529_v39 = vmul.f32 0.5, %v1528_v1 }
 0x7e1   :  { %v1537_v42 = vmul.f32 0.5, %v1536_v38 }
 0x7e2   :  { %v1542_v47 = vmul.f32 %v1540_v40, %v1529_v39 }
 0x7e3   :  { %v1549_v48 = vmul.f32 %v1547_v46, %v1537_v42  ;;  %v1545_v51 = vsub.f32 1.0, %v1537_v42 }
 0x7e4   :  { %v1543_v49 = vadd.f32 %v1542_v47, %v2471_v12 }
 0x7e6   :  { %2292 = vtanh.f32 %v1543_v49 }
 0x7e7   :  { %2294 = vrsqrt.f32 %v1750_v50 }
 0x7f0   :  { %v2293_v52 = vpop.eup %2292 }
 0x7f1   :  { %v1546_v53 = vmul.f32 %v2293_v52, %v1545_v51  ;;  %v2295_v54 = vpop.eup %2294 }
 0x7f2   :  { %v1754_v59 = vmul.f32 %v2295_v54, %v2558_v28 }
 0x7f3   :  { %v1550_v56 = vadd.f32 %v1549_v48, %v1546_v53 }
 0x7f5   :  { %1551 = vst.msk [vmem:[#allocation2 + $0x8] sm:$0x30] %vm860_vm6, %v1550_v56  ;;  %v1553_v58 = vrot.slane %v1550_v56, 4  ;;  %v1722_v16 = vrot.slane %v1550_v56, 6 }
 0x7f7   :  { %1897 = vmatmul.mubr.msk.f32.vlgmr.msra.gmra.mrb[18].mxu1 %vm346_vm3, %v1553_v58  ;;  %2073 = vmatmul.mubr.msk.f32.vlgmr.msra.gmra.mrb[18].mxu0 %vm346_vm3, %v1553_v58 }
 0x7f8   :  { %2083 = vmatprep.mubr.msk.f32.mxu1 %vm346_vm3, %v1754_v59 }
 0x8ca   :  { %v1622_v60 = vpop.f32.mrb[18].mxu1  ;;  %v1693_v62 = vpop.f32.mrb[18].mxu0 }
 0x8cb   :  { %v1698_v63 = vrot.slane %v1622_v60, 2  ;;  %v1624_v2 = vpop.f32.mrb[19].mxu1  ;;  %v2074_v3 = vpop.f32.mrb[19].mxu0  ;;  %v1713_v28 = vadd.f32 %v1693_v62, %v2483_v30 }
 0x8cc   :  { %v1706_v4 = vrot.slane %v1624_v2, 2 }
 0x8cd   :  { %v1700_v5 = vadd.f32 %v1698_v63, %v2473_v17  ;;  %v1715_v14 = vrot.slane %v1713_v28, 2 }
 0x8ce   :  { %v1708_v6 = vadd.f32 %v1706_v4, %v2475_v19 }
 0x8cf   :  { %v1701_v7 = vmul.f32 0.5, %v1700_v5 }
 0x8d0   :  { %v1709_v8 = vmul.f32 0.5, %v1708_v6 }
 0x8d1   :  { %2296 = vtanh.f32 %v1701_v7 }
 0x8d2   :  { %2298 = vtanh.f32 %v1709_v8 }
 0x8db   :  { %v2297_v9 = vpop.eup %2296 }
 0x8dc   :  { %v2299_v10 = vpop.eup %2298  ;;  %v1703_v43 = vadd.f32 1.0, %v2297_v9 }
 0x8dd   :  { %v1711_v11 = vadd.f32 1.0, %v2299_v10 }
 0x8de   :  { %v1704_v13 = vmul.f32 0.5, %v1703_v43 }
 0x8df   :  { %v1712_v15 = vmul.f32 0.5, %v1711_v11 }
 0x8e0   :  { %v1717_v20 = vmul.f32 %v1715_v14, %v1704_v13 }
 0x8e1   :  { %v1724_v24 = vmul.f32 %v1722_v16, %v1712_v15  ;;  %v1720_v19 = vsub.f32 1.0, %v1712_v15 }
 0x8e2   :  { %v1718_v17 = vadd.f32 %v1717_v20, %v2471_v12  ;;  %v83_v12 = vld [vmem:[#allocation6 + $0x1b0] sm:$0xff] }
 0x8e3   :  { %v2234_v32 = vpack.c.bf16 %v83_v12, %v82_v31 }
 0x8e4   :  { %2300 = vtanh.f32 %v1718_v17 }
 0x8e5   :  { %2235 = vmatprep.subr.bf16.mxu1 %v2234_v32 }
 0x8e6   :  { %2237 = vmatpush3.bf16.msra.mxu1 %v2234_v32 }
 0x8e7   :  { %2239 = vmatprep.subr.bf16.mxu1 %v2238_v61 }
 0x8ea   :  { %2241 = vmatpush3.bf16.msra.mxu1 %v2238_v61 }
 0x8ee   :  { %v2301_v18 = vpop.eup %2300 }
 0x8ef   :  { %v1721_v21 = vmul.f32 %v2301_v18, %v1720_v19 }
 0x8f1   :  { %v1725_v22 = vadd.f32 %v1724_v24, %v1721_v21 }
 0x8f3   :  { %1726 = vst.msk [vmem:[#allocation2 + $0x8] sm:$0xc0] %vm1036_vm7, %v1725_v22 }
 0x8fa   :  { %v1728_v30 = vld [vmem:[#allocation2 + $0x8] sm:$0xff] }
 0x8fb   :  { %v1732_v23 = vsel %vm346_vm3, %v1728_v30, 0.0 }
 0x8fc   :  { %1733 = vadd.xlane.f32.xlu0 %v1732_v23 }
 0x989   :  { %v1734_v35 = vpop.xlane.xlu0 %1733 }
 0x98a   :  { %v1737_v25 = vmul.f32 0.03125, %v1734_v35 }
 0x98c   :  { %v1739_v26 = vsub.f32 %v1728_v30, %v1737_v25 }
 0x98e   :  { %v1741_v27 = vmul.f32 %v1739_v26, %v1739_v26 }
 0x990   :  { %v1745_v29 = vsel %vm346_vm3, %v1741_v27, 0.0 }
 0x991   :  { %1746 = vadd.xlane.f32.xlu1 %v1745_v29 }
 0xa1e   :  { %v1747_v57 = vpop.xlane.xlu1 %1746 }
 0xa1f   :  { %v1749_v45 = vmul.f32 0.03125, %v1747_v57 }
 0xa21   :  { %v1751_v34 = vadd.f32 1e-05, %v1749_v45 }
 0xa23   :  { %2302 = vrsqrt.f32 %v1751_v34 }
 0xa2d   :  { %v2303_v44 = vpop.eup %2302 }
 0xa2e   :  { %v1755_v36 = vmul.f32 %v2303_v44, %v1739_v26 }
 0xa30   :  { %2084 = vmatmul.mubr.msk.f32.vlgmr.msra.gmra.mrb[20].mxu1 %vm346_vm3, %v1755_v36 }
 0xb03   :  { %v2085_v37 = vpop.f32.mrb[20].mxu1 }
 0xb04   :  { %v1828_v1 = vpop.f32.mrb[21].mxu1  ;;  %v1834_v40 = vadd.f32 %v2085_v37, %v86_v0 }
 0xb05   :  { %v1829_v38 = vadd.f32 %v1828_v1, %v86_v0 }
 0xb06   :  { %v1838_v47 = vmax.f32 %v1834_v40, 0.0 }
 0xb07   :  { %v1837_v39 = vmax.f32 %v1829_v38, 0.0 }
 0xb08   :  { %v1851_v51 = vrot.slane %v1838_v47, 2  ;;  %v1854_v53 = vrot.slane %v1838_v47, 4  ;;  %v1857_v58 = vrot.slane %v1838_v47, 6 }
 0xb09   :  { %v1840_v41 = vrot.slane %v1837_v39, 2  ;;  %v1843_v46 = vrot.slane %v1837_v39, 4  ;;  %v1846_v49 = vrot.slane %v1837_v39, 6 }
 0xb0b   :  { %v1842_v42 = vadd.f32 %v1840_v41, %v1837_v39 }
 0xb0d   :  { %v1845_v48 = vadd.f32 %v1843_v46, %v1842_v42 }
 0xb0f   :  { %v1848_v50 = vadd.f32 %v1846_v49, %v1845_v48 }
 0xb11   :  { %v1849_v52 = vadd.f32 %v1848_v50, %v1838_v47 }
 0xb13   :  { %v1853_v54 = vadd.f32 %v1851_v51, %v1849_v52 }
 0xb15   :  { %v1856_v56 = vadd.f32 %v1854_v53, %v1853_v54 }
 0xb17   :  { %v1859_v59 = vadd.f32 %v1857_v58, %v1856_v56 }
 0xb19   :  { %v1860_v60 = vmul.f32 0.125, %v1859_v59 }
 0xb1b   :  { %1862 = vst.msk [vmem:[#allocation8] sm:$0x3] %vm1861_vm8, %v1860_v60 }
 0xb1c   :  { %2359 = shalt.err (!%p2356_p6)
}
 0xb1d   :  { %s2360_s12 = scalar_lea.hbm %s2628_s2, 32 }
 0xb1e   :  { %p2361_p7 = scmp.ne.s32.totalorder %s2628_s2, %s2360_s12  ;;  %p2364_p8 = scmp.lt.u32.totalorder %s2360_s12, %s2628_s2 }
 0xb20   :  { %p2366_p9 = pnand %p2364_p8, %p2361_p7 }
 0xb22   :  { %2369 = shalt.err (!%p2366_p9)
}
 0xb23   :  { %1872 = dma.vmem_to_hbm [thread:$0]  %s1870_s8, 32, %s2628_s2, [#allocation5]  }
 0xb24   :  { %2374 = dma.done.wait [#allocation5], 32  }
 0xb25   :  { %2375 = vsyncadd [#allocation5], 4294967264 }
 0xb26   :  { %1876 = vsyncpa [#allocation4], 1 }
 0xb27   :  { %1877 = vsyncpa [#allocation7], 1 }
 0xb28   :  { %1878 = vsyncpa [#allocation5], 1 }

</bundles_post_ra>
